<compile_context>
chip_gen: v5e
topology: v5e:2x2
jax: 0.10.0
libtpu: 0.0.40
codegen_flags: <defaults>
</compile_context>

<pallas_src>
import numpy as np
import jax
import jax.numpy as jnp
from jax.experimental import pallas as pl
from jax.experimental.pallas import tpu as pltpu


HIDDEN_DIMS = [256, 128, 32, 128, 256]      # logical (PyTorch) hidden sizes
PADDED_HIDDEN = [256, 128, 128, 128, 256]   # 32 -> 128 lane padding (zero-filled)
MAX_BATCH_TILE = 512                        # biggest tile that comfortably fits scoped VMEM


def _round_up(n, m):
    return ((n + m - 1) // m) * m


def _leaky_relu(h, slope=0.2):
    # nn.LeakyReLU(0.2), computed in f32
    return jnp.where(h > 0, h, slope * h)


def mlp_kernel(x_ref,
               w1, b1, w2, b2, w3, b3, w4, b4, w5, b5, w6, b6,
               o_ref):
    """One batch tile of the 6-layer MLP.

    Weights are bf16 and VMEM-resident across the whole grid (constant index_map);
    activations are cast to bf16 right before each MXU matmul and accumulated in f32,
    with bias add + LeakyReLU done in f32.
    """
    def layer(h_f32, w_ref, b_ref, act):
        acc = jnp.dot(h_f32.astype(jnp.bfloat16), w_ref[...],
                      preferred_element_type=jnp.float32)
        acc = acc + b_ref[...]
        return _leaky_relu(acc) if act else acc

    h = x_ref[...]                      # (TB, in_pad) f32
    h = layer(h, w1, b1, True)          # Linear(in, 256)  + LeakyReLU(0.2)
    h = layer(h, w2, b2, True)          # Linear(256, 128) + LeakyReLU(0.2)
    h = layer(h, w3, b3, True)          # Linear(128, 32->128 padded) + LeakyReLU(0.2)
    h = layer(h, w4, b4, True)          # Linear(32->128 padded, 128) + LeakyReLU(0.2)
    h = layer(h, w5, b5, True)          # Linear(128, 256) + LeakyReLU(0.2)
    h = layer(h, w6, b6, False)         # Linear(256, out)  (no activation)
    o_ref[...] = h.astype(o_ref.dtype)


def init_params(key, adv_in_dim, x_dim):
    """Deterministic PyTorch-Linear-style init at the *logical* sizes.

    Weights are stored as (in, out) (transposed vs torch's (out, in)) so the kernel
    computes x @ W + b, matching torch's x @ W.T + b.
    """
    dims = [int(np.prod(adv_in_dim))] + HIDDEN_DIMS + [int(np.prod(x_dim))]
    params = []
    for i in range(len(dims) - 1):
        key, kw, kb = jax.random.split(key, 3)
        bound = 1.0 / np.sqrt(dims[i])
        w = jax.random.uniform(kw, (dims[i], dims[i + 1]), jnp.float32, -bound, bound)
        b = jax.random.uniform(kb, (1, dims[i + 1]), jnp.float32, -bound, bound)
        params += [w, b]
    return params


def prepare_params(params, adv_in_dim, x_dim):
    """Zero-pad feature dims to multiples of 128 and cast weights to bf16.

    Padding is mathematically exact: padded input columns are zero, padded weight
    rows/cols are zero, padded biases are zero, and LeakyReLU(0) == 0, so padded
    lanes carry zeros through the network and are sliced off at the end.
    """
    in_feat = int(np.prod(adv_in_dim))
    out_feat = int(np.prod(x_dim))
    dims = [in_feat] + HIDDEN_DIMS + [out_feat]
    pdims = [_round_up(in_feat, 128)] + PADDED_HIDDEN + [_round_up(out_feat, 128)]

    prepped = []
    for i in range(len(dims) - 1):
        w = params[2 * i]
        b = params[2 * i + 1]
        w = jnp.pad(w, ((0, pdims[i] - dims[i]), (0, pdims[i + 1] - dims[i + 1])))
        b = jnp.pad(b, ((0, 0), (0, pdims[i + 1] - dims[i + 1])))
        prepped += [w.astype(jnp.bfloat16), b.astype(jnp.float32)]
    return prepped, pdims


def my_autoencoder_forward(x, prepped_params, pdims, x_dim):
    """Forward pass: first_layer(Identity) -> Flatten -> MLP (Pallas) -> LayerReshape."""
    B = x.shape[0]
    out_feat = int(np.prod(x_dim))
    in_pad, out_pad = pdims[0], pdims[-1]

    flat = x.reshape(B, -1).astype(jnp.float32)          # nn.Flatten() on NCHW
    in_feat = flat.shape[1]
    if in_pad != in_feat:
        flat = jnp.pad(flat, ((0, 0), (0, in_pad - in_feat)))

    # Batch tiling: at least 8 rows (vreg sublane), capped so double-buffered I/O +
    # resident bf16 weights stay well inside scoped VMEM on v5e/v6e/v7x.
    TB = min(MAX_BATCH_TILE, _round_up(B, 8))
    B_pad = _round_up(B, TB)
    if B_pad != B:
        flat = jnp.pad(flat, ((0, B_pad - B), (0, 0)))
    grid = (B_pad // TB,)

    # Specs: x / out tiled over the batch grid; weights & biases resident (constant map).
    x_spec = pl.BlockSpec((TB, in_pad), lambda i: (i, 0))
    out_spec = pl.BlockSpec((TB, out_pad), lambda i: (i, 0))
    param_specs = [pl.BlockSpec(p.shape, lambda i: (0, 0)) for p in prepped_params]

    flops = 2 * B_pad * sum(pdims[j] * pdims[j + 1] for j in range(len(pdims) - 1))
    weight_bytes = sum(int(np.prod(p.shape)) * p.dtype.itemsize for p in prepped_params)
    bytes_accessed = weight_bytes + B_pad * (in_pad + out_pad) * 4

    out = pl.pallas_call(
        mlp_kernel,
        out_shape=jax.ShapeDtypeStruct((B_pad, out_pad), jnp.float32),
        grid=grid,
        in_specs=[x_spec] + param_specs,
        out_specs=out_spec,
        compiler_params=pltpu.CompilerParams(
            dimension_semantics=("parallel",),
            vmem_limit_bytes=32 * 1024 * 1024,
        ),
        cost_estimate=pl.CostEstimate(
            flops=flops, bytes_accessed=bytes_accessed, transcendentals=0),
    )(flat, *prepped_params)

    out = out[:B, :out_feat]
    return out.reshape((B,) + tuple(x_dim))              # LayerReshape(x_dim); output = Identity()


if __name__ == "__main__":
    key = jax.random.PRNGKey(0)
    adv_in_dim = (4, 16, 16)    # prod = 1024
    x_dim = (4, 16, 16)         # prod = 1024
    batch = 2

    kx, kp = jax.random.split(key)
    x = jax.random.normal(kx, (batch,) + adv_in_dim, jnp.float32)
    raw_params = init_params(kp, adv_in_dim, x_dim)
    params, pdims = prepare_params(raw_params, adv_in_dim, x_dim)

    fwd = jax.jit(lambda xx: my_autoencoder_forward(xx, params, pdims, x_dim))
    y = fwd(x)
    y = jax.block_until_ready(y)

    assert y.shape == (batch,) + x_dim, y.shape
    assert y.dtype == jnp.float32
    assert bool(jnp.all(jnp.isfinite(y)))
    print("KERNEL_OK")
</pallas_src>

<mosaic_0001>
module attributes {stable_mosaic.version = 11 : i64} {
  func.func @mlp_kernel(%arg0: i32, %arg1: memref<8x1024xf32, #tpu.memory_space<vmem>>, %arg2: memref<1024x256xbf16, #tpu.memory_space<vmem>>, %arg3: memref<1x256xf32, #tpu.memory_space<vmem>>, %arg4: memref<256x128xbf16, #tpu.memory_space<vmem>>, %arg5: memref<1x128xf32, #tpu.memory_space<vmem>>, %arg6: memref<128x128xbf16, #tpu.memory_space<vmem>>, %arg7: memref<1x128xf32, #tpu.memory_space<vmem>>, %arg8: memref<128x128xbf16, #tpu.memory_space<vmem>>, %arg9: memref<1x128xf32, #tpu.memory_space<vmem>>, %arg10: memref<128x256xbf16, #tpu.memory_space<vmem>>, %arg11: memref<1x256xf32, #tpu.memory_space<vmem>>, %arg12: memref<256x1024xbf16, #tpu.memory_space<vmem>>, %arg13: memref<1x1024xf32, #tpu.memory_space<vmem>>, %arg14: memref<8x1024xf32, #tpu.memory_space<vmem>>) attributes {dimension_semantics = [#tpu.dimension_semantics<parallel>], iteration_bounds = array<i64: 1>, scalar_prefetch = 0 : i64, scratch_operands = 0 : i64, tpu.core_type = #tpu.core_type<tc>, window_params = [{transform_indices = @transform_0, window_bounds = array<i64: 8, 1024>}, {pipeline_mode = #tpu.pipeline_mode<synchronous>, transform_indices = @transform_1, window_bounds = array<i64: 1024, 256>}, {pipeline_mode = #tpu.pipeline_mode<synchronous>, transform_indices = @transform_2, window_bounds = array<i64: 1, 256>}, {pipeline_mode = #tpu.pipeline_mode<synchronous>, transform_indices = @transform_3, window_bounds = array<i64: 256, 128>}, {pipeline_mode = #tpu.pipeline_mode<synchronous>, transform_indices = @transform_4, window_bounds = array<i64: 1, 128>}, {pipeline_mode = #tpu.pipeline_mode<synchronous>, transform_indices = @transform_5, window_bounds = array<i64: 128, 128>}, {pipeline_mode = #tpu.pipeline_mode<synchronous>, transform_indices = @transform_6, window_bounds = array<i64: 1, 128>}, {pipeline_mode = #tpu.pipeline_mode<synchronous>, transform_indices = @transform_7, window_bounds = array<i64: 128, 128>}, {pipeline_mode = #tpu.pipeline_mode<synchronous>, transform_indices = @transform_8, window_bounds = array<i64: 1, 128>}, {pipeline_mode = #tpu.pipeline_mode<synchronous>, transform_indices = @transform_9, window_bounds = array<i64: 128, 256>}, {pipeline_mode = #tpu.pipeline_mode<synchronous>, transform_indices = @transform_10, window_bounds = array<i64: 1, 256>}, {pipeline_mode = #tpu.pipeline_mode<synchronous>, transform_indices = @transform_11, window_bounds = array<i64: 256, 1024>}, {pipeline_mode = #tpu.pipeline_mode<synchronous>, transform_indices = @transform_12, window_bounds = array<i64: 1, 1024>}, {transform_indices = @transform_13, window_bounds = array<i64: 8, 1024>}]} {
    %c0 = arith.constant 0 : index
    %c0_0 = arith.constant 0 : index
    %0 = vector.load %arg1[%c0, %c0_0] : memref<8x1024xf32, #tpu.memory_space<vmem>>, vector<8x1024xf32>
    %1 = arith.truncf %0 : vector<8x1024xf32> to vector<8x1024xbf16>
    %c0_1 = arith.constant 0 : index
    %c0_2 = arith.constant 0 : index
    %2 = vector.load %arg2[%c0_1, %c0_2] : memref<1024x256xbf16, #tpu.memory_space<vmem>>, vector<1024x256xbf16>
    %cst = arith.constant dense<0.000000e+00> : vector<8x256xf32>
    %3 = tpu.matmul %1, %2, %cst {dimension_numbers = #tpu.dot_dimension_numbers<[1], [0], [0], [1], [0, 0, 1, 1], [], []>} : vector<8x1024xbf16>, vector<1024x256xbf16>, vector<8x256xf32> -> vector<8x256xf32>
    %c0_3 = arith.constant 0 : index
    %c0_4 = arith.constant 0 : index
    %4 = vector.load %arg3[%c0_3, %c0_4] : memref<1x256xf32, #tpu.memory_space<vmem>>, vector<1x256xf32>
    %5 = vector.broadcast %4 : vector<1x256xf32> to vector<8x256xf32>
    %6 = arith.addf %3, %5 : vector<8x256xf32>
    %cst_5 = arith.constant 0.000000e+00 : f32
    %7 = vector.broadcast %cst_5 : f32 to vector<8x256xf32>
    %8 = arith.cmpf ogt, %6, %7 : vector<8x256xf32>
    %cst_6 = arith.constant 2.000000e-01 : f32
    %9 = vector.broadcast %cst_6 : f32 to vector<8x256xf32>
    %10 = arith.mulf %9, %6 : vector<8x256xf32>
    %11 = arith.select %8, %6, %10 : vector<8x256xi1>, vector<8x256xf32>
    %12 = arith.truncf %11 : vector<8x256xf32> to vector<8x256xbf16>
    %c0_7 = arith.constant 0 : index
    %c0_8 = arith.constant 0 : index
    %13 = vector.load %arg4[%c0_7, %c0_8] : memref<256x128xbf16, #tpu.memory_space<vmem>>, vector<256x128xbf16>
    %cst_9 = arith.constant dense<0.000000e+00> : vector<8x128xf32>
    %14 = tpu.matmul %12, %13, %cst_9 {dimension_numbers = #tpu.dot_dimension_numbers<[1], [0], [0], [1], [0, 0, 1, 1], [], []>} : vector<8x256xbf16>, vector<256x128xbf16>, vector<8x128xf32> -> vector<8x128xf32>
    %c0_10 = arith.constant 0 : index
    %c0_11 = arith.constant 0 : index
    %15 = vector.load %arg5[%c0_10, %c0_11] : memref<1x128xf32, #tpu.memory_space<vmem>>, vector<1x128xf32>
    %16 = vector.broadcast %15 : vector<1x128xf32> to vector<8x128xf32>
    %17 = arith.addf %14, %16 : vector<8x128xf32>
    %cst_12 = arith.constant 0.000000e+00 : f32
    %18 = vector.broadcast %cst_12 : f32 to vector<8x128xf32>
    %19 = arith.cmpf ogt, %17, %18 : vector<8x128xf32>
    %cst_13 = arith.constant 2.000000e-01 : f32
    %20 = vector.broadcast %cst_13 : f32 to vector<8x128xf32>
    %21 = arith.mulf %20, %17 : vector<8x128xf32>
    %22 = arith.select %19, %17, %21 : vector<8x128xi1>, vector<8x128xf32>
    %23 = arith.truncf %22 : vector<8x128xf32> to vector<8x128xbf16>
    %c0_14 = arith.constant 0 : index
    %c0_15 = arith.constant 0 : index
    %24 = vector.load %arg6[%c0_14, %c0_15] : memref<128x128xbf16, #tpu.memory_space<vmem>>, vector<128x128xbf16>
    %cst_16 = arith.constant dense<0.000000e+00> : vector<8x128xf32>
    %25 = tpu.matmul %23, %24, %cst_16 {dimension_numbers = #tpu.dot_dimension_numbers<[1], [0], [0], [1], [0, 0, 1, 1], [], []>} : vector<8x128xbf16>, vector<128x128xbf16>, vector<8x128xf32> -> vector<8x128xf32>
    %c0_17 = arith.constant 0 : index
    %c0_18 = arith.constant 0 : index
    %26 = vector.load %arg7[%c0_17, %c0_18] : memref<1x128xf32, #tpu.memory_space<vmem>>, vector<1x128xf32>
    %27 = vector.broadcast %26 : vector<1x128xf32> to vector<8x128xf32>
    %28 = arith.addf %25, %27 : vector<8x128xf32>
    %cst_19 = arith.constant 0.000000e+00 : f32
    %29 = vector.broadcast %cst_19 : f32 to vector<8x128xf32>
    %30 = arith.cmpf ogt, %28, %29 : vector<8x128xf32>
    %cst_20 = arith.constant 2.000000e-01 : f32
    %31 = vector.broadcast %cst_20 : f32 to vector<8x128xf32>
    %32 = arith.mulf %31, %28 : vector<8x128xf32>
    %33 = arith.select %30, %28, %32 : vector<8x128xi1>, vector<8x128xf32>
    %34 = arith.truncf %33 : vector<8x128xf32> to vector<8x128xbf16>
    %c0_21 = arith.constant 0 : index
    %c0_22 = arith.constant 0 : index
    %35 = vector.load %arg8[%c0_21, %c0_22] : memref<128x128xbf16, #tpu.memory_space<vmem>>, vector<128x128xbf16>
    %cst_23 = arith.constant dense<0.000000e+00> : vector<8x128xf32>
    %36 = tpu.matmul %34, %35, %cst_23 {dimension_numbers = #tpu.dot_dimension_numbers<[1], [0], [0], [1], [0, 0, 1, 1], [], []>} : vector<8x128xbf16>, vector<128x128xbf16>, vector<8x128xf32> -> vector<8x128xf32>
    %c0_24 = arith.constant 0 : index
    %c0_25 = arith.constant 0 : index
    %37 = vector.load %arg9[%c0_24, %c0_25] : memref<1x128xf32, #tpu.memory_space<vmem>>, vector<1x128xf32>
    %38 = vector.broadcast %37 : vector<1x128xf32> to vector<8x128xf32>
    %39 = arith.addf %36, %38 : vector<8x128xf32>
    %cst_26 = arith.constant 0.000000e+00 : f32
    %40 = vector.broadcast %cst_26 : f32 to vector<8x128xf32>
    %41 = arith.cmpf ogt, %39, %40 : vector<8x128xf32>
    %cst_27 = arith.constant 2.000000e-01 : f32
    %42 = vector.broadcast %cst_27 : f32 to vector<8x128xf32>
    %43 = arith.mulf %42, %39 : vector<8x128xf32>
    %44 = arith.select %41, %39, %43 : vector<8x128xi1>, vector<8x128xf32>
    %45 = arith.truncf %44 : vector<8x128xf32> to vector<8x128xbf16>
    %c0_28 = arith.constant 0 : index
    %c0_29 = arith.constant 0 : index
    %46 = vector.load %arg10[%c0_28, %c0_29] : memref<128x256xbf16, #tpu.memory_space<vmem>>, vector<128x256xbf16>
    %cst_30 = arith.constant dense<0.000000e+00> : vector<8x256xf32>
    %47 = tpu.matmul %45, %46, %cst_30 {dimension_numbers = #tpu.dot_dimension_numbers<[1], [0], [0], [1], [0, 0, 1, 1], [], []>} : vector<8x128xbf16>, vector<128x256xbf16>, vector<8x256xf32> -> vector<8x256xf32>
    %c0_31 = arith.constant 0 : index
    %c0_32 = arith.constant 0 : index
    %48 = vector.load %arg11[%c0_31, %c0_32] : memref<1x256xf32, #tpu.memory_space<vmem>>, vector<1x256xf32>
    %49 = vector.broadcast %48 : vector<1x256xf32> to vector<8x256xf32>
    %50 = arith.addf %47, %49 : vector<8x256xf32>
    %cst_33 = arith.constant 0.000000e+00 : f32
    %51 = vector.broadcast %cst_33 : f32 to vector<8x256xf32>
    %52 = arith.cmpf ogt, %50, %51 : vector<8x256xf32>
    %cst_34 = arith.constant 2.000000e-01 : f32
    %53 = vector.broadcast %cst_34 : f32 to vector<8x256xf32>
    %54 = arith.mulf %53, %50 : vector<8x256xf32>
    %55 = arith.select %52, %50, %54 : vector<8x256xi1>, vector<8x256xf32>
    %56 = arith.truncf %55 : vector<8x256xf32> to vector<8x256xbf16>
    %c0_35 = arith.constant 0 : index
    %c0_36 = arith.constant 0 : index
    %57 = vector.load %arg12[%c0_35, %c0_36] : memref<256x1024xbf16, #tpu.memory_space<vmem>>, vector<256x1024xbf16>
    %cst_37 = arith.constant dense<0.000000e+00> : vector<8x1024xf32>
    %58 = tpu.matmul %56, %57, %cst_37 {dimension_numbers = #tpu.dot_dimension_numbers<[1], [0], [0], [1], [0, 0, 1, 1], [], []>} : vector<8x256xbf16>, vector<256x1024xbf16>, vector<8x1024xf32> -> vector<8x1024xf32>
    %c0_38 = arith.constant 0 : index
    %c0_39 = arith.constant 0 : index
    %59 = vector.load %arg13[%c0_38, %c0_39] : memref<1x1024xf32, #tpu.memory_space<vmem>>, vector<1x1024xf32>
    %60 = vector.broadcast %59 : vector<1x1024xf32> to vector<8x1024xf32>
    %61 = arith.addf %58, %60 : vector<8x1024xf32>
    %c0_40 = arith.constant 0 : index
    %c0_41 = arith.constant 0 : index
    %62 = vector.load %arg14[%c0_40, %c0_41] : memref<8x1024xf32, #tpu.memory_space<vmem>>, vector<8x1024xf32>
    tpu.vector_store %arg14[%c0_40, %c0_41], %61 {strides = array<i32>} : memref<8x1024xf32, #tpu.memory_space<vmem>>, vector<8x1024xf32>,
    return
  }
  func.func @transform_0(%arg0: i32) -> (i32, i32) {
    %c0_i32 = arith.constant 0 : i32
    %c0_i32_0 = arith.constant 0 : i32
    return %arg0, %c0_i32 : i32, i32
  }
  func.func @transform_1(%arg0: i32) -> (i32, i32) {
    %c0_i32 = arith.constant 0 : i32
    %c0_i32_0 = arith.constant 0 : i32
    %c0_i32_1 = arith.constant 0 : i32
    return %c0_i32, %c0_i32_0 : i32, i32
  }
  func.func @transform_2(%arg0: i32) -> (i32, i32) {
    %c0_i32 = arith.constant 0 : i32
    %c0_i32_0 = arith.constant 0 : i32
    %c0_i32_1 = arith.constant 0 : i32
    return %c0_i32, %c0_i32_0 : i32, i32
  }
  func.func @transform_3(%arg0: i32) -> (i32, i32) {
    %c0_i32 = arith.constant 0 : i32
    %c0_i32_0 = arith.constant 0 : i32
    %c0_i32_1 = arith.constant 0 : i32
    return %c0_i32, %c0_i32_0 : i32, i32
  }
  func.func @transform_4(%arg0: i32) -> (i32, i32) {
    %c0_i32 = arith.constant 0 : i32
    %c0_i32_0 = arith.constant 0 : i32
    %c0_i32_1 = arith.constant 0 : i32
    return %c0_i32, %c0_i32_0 : i32, i32
  }
  func.func @transform_5(%arg0: i32) -> (i32, i32) {
    %c0_i32 = arith.constant 0 : i32
    %c0_i32_0 = arith.constant 0 : i32
    %c0_i32_1 = arith.constant 0 : i32
    return %c0_i32, %c0_i32_0 : i32, i32
  }
  func.func @transform_6(%arg0: i32) -> (i32, i32) {
    %c0_i32 = arith.constant 0 : i32
    %c0_i32_0 = arith.constant 0 : i32
    %c0_i32_1 = arith.constant 0 : i32
    return %c0_i32, %c0_i32_0 : i32, i32
  }
  func.func @transform_7(%arg0: i32) -> (i32, i32) {
    %c0_i32 = arith.constant 0 : i32
    %c0_i32_0 = arith.constant 0 : i32
    %c0_i32_1 = arith.constant 0 : i32
    return %c0_i32, %c0_i32_0 : i32, i32
  }
  func.func @transform_8(%arg0: i32) -> (i32, i32) {
    %c0_i32 = arith.constant 0 : i32
    %c0_i32_0 = arith.constant 0 : i32
    %c0_i32_1 = arith.constant 0 : i32
    return %c0_i32, %c0_i32_0 : i32, i32
  }
  func.func @transform_9(%arg0: i32) -> (i32, i32) {
    %c0_i32 = arith.constant 0 : i32
    %c0_i32_0 = arith.constant 0 : i32
    %c0_i32_1 = arith.constant 0 : i32
    return %c0_i32, %c0_i32_0 : i32, i32
  }
  func.func @transform_10(%arg0: i32) -> (i32, i32) {
    %c0_i32 = arith.constant 0 : i32
    %c0_i32_0 = arith.constant 0 : i32
    %c0_i32_1 = arith.constant 0 : i32
    return %c0_i32, %c0_i32_0 : i32, i32
  }
  func.func @transform_11(%arg0: i32) -> (i32, i32) {
    %c0_i32 = arith.constant 0 : i32
    %c0_i32_0 = arith.constant 0 : i32
    %c0_i32_1 = arith.constant 0 : i32
    return %c0_i32, %c0_i32_0 : i32, i32
  }
  func.func @transform_12(%arg0: i32) -> (i32, i32) {
    %c0_i32 = arith.constant 0 : i32
    %c0_i32_0 = arith.constant 0 : i32
    %c0_i32_1 = arith.constant 0 : i32
    return %c0_i32, %c0_i32_0 : i32, i32
  }
  func.func @transform_13(%arg0: i32) -> (i32, i32) {
    %c0_i32 = arith.constant 0 : i32
    %c0_i32_0 = arith.constant 0 : i32
    return %arg0, %c0_i32 : i32, i32
  }
}

</mosaic_0001>

<bundles_post_ra>
// kernel: _lambda_.1
= control target key start
LH: loop header
LB: loop body
LE: loop exit
PB: predicated region body
PF: predicated region fallthrough
CT: control target
= control target key end

     0   :  { %18 = vsyncpa [#allocation3], 0  ;;  %s4555_s0 = inlined_call_operand.vmem [shape: f32[8,1024], index: 0, kind: input, shape index: {}]   ;;  %s4556_s1 = inlined_call_operand.hbm [shape: bf16[1024,256], index: 1, kind: input, shape index: {}]   ;;  %s4557_s2 = inlined_call_operand.vmem [shape: f32[1,256], index: 2, kind: input, shape index: {}]   ;;  %s4558_s3 = inlined_call_operand.hbm [shape: bf16[256,128], index: 3, kind: input, shape index: {}]   ;;  %s4559_s4 = inlined_call_operand.vmem [shape: f32[1,128], index: 4, kind: input, shape index: {}]   ;;  %s4560_s5 = inlined_call_operand.hbm [shape: bf16[128,128], index: 5, kind: input, shape index: {}]   ;;  %s4561_s6 = inlined_call_operand.vmem [shape: f32[1,128], index: 6, kind: input, shape index: {}]   ;;  %s4562_s7 = inlined_call_operand.vmem [shape: bf16[128,128], index: 7, kind: input, shape index: {}]   ;;  %s4563_s8 = inlined_call_operand.vmem [shape: f32[1,128], index: 8, kind: input, shape index: {}]   ;;  %s4564_s9 = inlined_call_operand.vmem [shape: bf16[128,256], index: 9, kind: input, shape index: {}]   ;;  %s4565_s10 = inlined_call_operand.vmem [shape: f32[1,256], index: 10, kind: input, shape index: {}]   ;;  %s4566_s11 = inlined_call_operand.hbm [shape: bf16[256,1024], index: 11, kind: input, shape index: {}]   ;;  %s4567_s12 = inlined_call_operand.vmem [shape: f32[1,1024], index: 12, kind: input, shape index: {}]   ;;  %s4568_s13 = inlined_call_operand.vmem [shape: f32[8,1024], index: 13, kind: output, shape index: {}]  }
   0x1   :  { %19 = vsyncpa [#allocation5], 0  ;;  %s42_s27 = sshll.u32 %s4558_s3, 4  ;;  %s43_s27 = int_to_ptr.hbm [resolvable:$true] %s42_s27 }
   0x2   :  { %20 = vsyncpa [#allocation8], 0  ;;  %s4225_s28 = smov [#allocation4]   ;;  %s27_s15 = sshll.u32 %s4556_s1, 4  ;;  %s28_s15 = int_to_ptr.hbm [resolvable:$true] %s27_s15 }
   0x3   :  { %s44_s29 = sshll.u32 %s4225_s28, 4  ;;  %s4226_s16 = smov 64   ;;  %s45_s29 = int_to_ptr.vmem [resolvable:$true] %s44_s29 }
   0x4   :  { %s4227_s17 = smov 4   ;;  %s4228_s18 = smov [#allocation2]  }
   0x5   :  { %50 = dma.hbm_to_vmem [thread:$0]  %s43_s27, 2048, %s45_s29, [#allocation5], %s4226_s16, %s4226_s16, %s4227_s17  }
   0x6   :  { %s29_s19 = sshll.u32 %s4228_s18, 4  ;;  %s4229_s20 = smov 128   ;;  %s30_s19 = int_to_ptr.vmem [resolvable:$true] %s29_s19 }
   0x7   :  { %s4230_s21 = smov 8   ;;  %s57_s23 = sshll.u32 %s4560_s5, 4  ;;  %s58_s23 = int_to_ptr.hbm [resolvable:$true] %s57_s23 }
   0x8   :  { %35 = dma.hbm_to_vmem [thread:$0]  %s28_s15, 16384, %s30_s19, [#allocation3], %s4229_s20, %s4229_s20, %s4230_s21  }
   0x9   :  { %s4231_s24 = smov [#allocation6]   ;;  %s80_s28 = sshll.u32 %s4566_s11, 4  ;;  %s81_s28 = int_to_ptr.hbm [resolvable:$true] %s80_s28 }
   0xa   :  { %s59_s25 = sshll.u32 %s4231_s24, 4  ;;  %s4232_s27 = smov [#allocation7]   ;;  %s60_s25 = int_to_ptr.vmem [resolvable:$true] %s59_s25 }
   0xb   :  { %65 = dma.hbm_to_vmem [thread:$0]  %s58_s23, 1024, %s60_s25, [#allocation5], %s4226_s16, %s4226_s16, %s4227_s17  }
   0xc   :  { %s82_s29 = sshll.u32 %s4232_s27, 4  ;;  %s4233_s30 = smov 512   ;;  %s83_s29 = int_to_ptr.vmem [resolvable:$true] %s82_s29 }
   0xd   :  { %s4234_s14 = smov 32  }
   0xe   :  { %88 = dma.hbm_to_vmem [thread:$0]  %s81_s28, 16384, %s83_s29, [#allocation8], %s4233_s30, %s4233_s30, %s4234_s14  }
   0xf   :  { %4219 = dma.done.wait [#allocation3], 16384  }
  0x10   :  { %4220 = vsyncadd [#allocation3], 4294950912 }
  0x11   :  { %4221 = dma.done.wait [#allocation5], 3072  }
  0x12   :  { %4222 = vsyncadd [#allocation5], 4294964224 }
  0x13   :  { %4223 = dma.done.wait [#allocation8], 16384  }
  0x14   :  { %4224 = vsyncadd [#allocation8], 4294950912  ;;  %v2648_v0 = vld [vmem:[#allocation2 + $0x70] sm:$0xf]  ;;  %v3821_v1 = vld [vmem:[#allocation2 + $0x74] sm:$0xf0] }
  0x15   :  { %v2712_v2 = vld [vmem:[#allocation2 + $0xf0] sm:$0xf]  ;;  %v2649_v3 = vor.u32 %v3821_v1, %v2648_v0  ;;  %v3837_v4 = vld [vmem:[#allocation2 + $0xf4] sm:$0xf0]  ;;  %v2640_v11 = vld [vmem:[#allocation2 + $0x60] sm:$0xf] }
  0x16   :  { %v2776_v5 = vld [vmem:[#allocation2 + $0x170] sm:$0xf]  ;;  %v3853_v6 = vld [vmem:[#allocation2 + $0x174] sm:$0xf0]  ;;  %v2713_v7 = vor.u32 %v3837_v4, %v2712_v2  ;;  %v3819_v13 = vld [vmem:[#allocation2 + $0x64] sm:$0xf0] }
  0x17   :  { %v2777_v8 = vor.u32 %v3853_v6, %v2776_v5  ;;  %v2840_v9 = vld [vmem:[#allocation2 + $0x1f0] sm:$0xf]  ;;  %v3869_v10 = vld [vmem:[#allocation2 + $0x1f4] sm:$0xf0]  ;;  %897 = vmatpush.bf16.msra.mxu0 %v2649_v3  ;;  %v2704_v14 = vld [vmem:[#allocation2 + $0xe0] sm:$0xf]  ;;  %v2641_v16 = vor.u32 %v3819_v13, %v2640_v11 }
  0x18   :  { %v2841_v12 = vor.u32 %v3869_v10, %v2840_v9  ;;  %v3835_v15 = vld [vmem:[#allocation2 + $0xe4] sm:$0xf0]  ;;  %910 = vmatpush.bf16.msra.mxu1 %v2713_v7  ;;  %v2768_v18 = vld [vmem:[#allocation2 + $0x160] sm:$0xf]  ;;  %v2632_v23 = vld [vmem:[#allocation2 + $0x50] sm:$0xf] }
  0x19   :  { %923 = vmatpush.bf16.msra.mxu2 %v2777_v8  ;;  %v2705_v17 = vor.u32 %v3835_v15, %v2704_v14  ;;  %v3851_v19 = vld [vmem:[#allocation2 + $0x164] sm:$0xf0]  ;;  %v2832_v20 = vld [vmem:[#allocation2 + $0x1e0] sm:$0xf]  ;;  %v3817_v24 = vld [vmem:[#allocation2 + $0x54] sm:$0xf0] }
  0x1a   :  { %936 = vmatpush.bf16.msra.mxu3 %v2841_v12  ;;  %v2769_v21 = vor.u32 %v3851_v19, %v2768_v18  ;;  %v3867_v22 = vld [vmem:[#allocation2 + $0x1e4] sm:$0xf0]  ;;  %v2696_v26 = vld [vmem:[#allocation2 + $0xd0] sm:$0xf]  ;;  %v3833_v27 = vld [vmem:[#allocation2 + $0xd4] sm:$0xf0]  ;;  %v2633_v29 = vor.u32 %v3817_v24, %v2632_v23 }
  0x1b   :  { %v2833_v25 = vor.u32 %v3867_v22, %v2832_v20  ;;  %v2760_v28 = vld [vmem:[#allocation2 + $0x150] sm:$0xf]  ;;  %898 = vmatpush.bf16.msra.mxu0 %v2641_v16  ;;  %v3849_v30 = vld [vmem:[#allocation2 + $0x154] sm:$0xf0]  ;;  %v2697_v33 = vor.u32 %v3833_v27, %v2696_v26  ;;  %v2624_v35 = vld [vmem:[#allocation2 + $0x40] sm:$0xf] }
  0x1c   :  { %v2824_v31 = vld [vmem:[#allocation2 + $0x1d0] sm:$0xf]  ;;  %v3865_v32 = vld [vmem:[#allocation2 + $0x1d4] sm:$0xf0]  ;;  %911 = vmatpush.bf16.msra.mxu1 %v2705_v17  ;;  %v2761_v34 = vor.u32 %v3849_v30, %v2760_v28  ;;  %v3815_v36 = vld [vmem:[#allocation2 + $0x44] sm:$0xf0] }
  0x1d   :  { %924 = vmatpush.bf16.msra.mxu2 %v2769_v21  ;;  %v2688_v37 = vld [vmem:[#allocation2 + $0xc0] sm:$0xf]  ;;  %v2825_v38 = vor.u32 %v3865_v32, %v2824_v31  ;;  %v3831_v39 = vld [vmem:[#allocation2 + $0xc4] sm:$0xf0]  ;;  %v2625_v44 = vor.u32 %v3815_v36, %v2624_v35  ;;  %v2616_v47 = vld [vmem:[#allocation2 + $0x30] sm:$0xf] }
  0x1e   :  { %937 = vmatpush.bf16.msra.mxu3 %v2833_v25  ;;  %v2752_v40 = vld [vmem:[#allocation2 + $0x140] sm:$0xf]  ;;  %v3847_v41 = vld [vmem:[#allocation2 + $0x144] sm:$0xf0]  ;;  %v2689_v45 = vor.u32 %v3831_v39, %v2688_v37  ;;  %v3813_v48 = vld [vmem:[#allocation2 + $0x34] sm:$0xf0] }
  0x1f   :  { %v2816_v42 = vld [vmem:[#allocation2 + $0x1c0] sm:$0xf]  ;;  %v3863_v43 = vld [vmem:[#allocation2 + $0x1c4] sm:$0xf0]  ;;  %899 = vmatpush.bf16.msra.mxu0 %v2633_v29  ;;  %v2753_v46 = vor.u32 %v3847_v41, %v2752_v40  ;;  %v2680_v49 = vld [vmem:[#allocation2 + $0xb0] sm:$0xf]  ;;  %v2617_v56 = vor.u32 %v3813_v48, %v2616_v47 }
  0x20   :  { %912 = vmatpush.bf16.msra.mxu1 %v2697_v33  ;;  %v2817_v50 = vor.u32 %v3863_v43, %v2816_v42  ;;  %v3829_v51 = vld [vmem:[#allocation2 + $0xb4] sm:$0xf0]  ;;  %v2744_v52 = vld [vmem:[#allocation2 + $0x130] sm:$0xf]  ;;  %v2608_v59 = vld [vmem:[#allocation2 + $0x20] sm:$0xf] }
  0x21   :  { %925 = vmatpush.bf16.msra.mxu2 %v2761_v34  ;;  %v3845_v53 = vld [vmem:[#allocation2 + $0x134] sm:$0xf0]  ;;  %v2808_v54 = vld [vmem:[#allocation2 + $0x1b0] sm:$0xf]  ;;  %v2681_v57 = vor.u32 %v3829_v51, %v2680_v49  ;;  %v3811_v60 = vld [vmem:[#allocation2 + $0x24] sm:$0xf0] }
  0x22   :  { %938 = vmatpush.bf16.msra.mxu3 %v2825_v38  ;;  %v3861_v55 = vld [vmem:[#allocation2 + $0x1b4] sm:$0xf0]  ;;  %v2745_v58 = vor.u32 %v3845_v53, %v2744_v52  ;;  %v2672_v61 = vld [vmem:[#allocation2 + $0xa0] sm:$0xf]  ;;  %v3827_v63 = vld [vmem:[#allocation2 + $0xa4] sm:$0xf0]  ;;  %v2609_v4 = vor.u32 %v3811_v60, %v2608_v59 }
  0x23   :  { %900 = vmatpush.bf16.msra.mxu0 %v2625_v44  ;;  %v2809_v62 = vor.u32 %v3861_v55, %v2808_v54  ;;  %v2736_v0 = vld [vmem:[#allocation2 + $0x120] sm:$0xf]  ;;  %v3843_v1 = vld [vmem:[#allocation2 + $0x124] sm:$0xf0]  ;;  %v2673_v5 = vor.u32 %v3827_v63, %v2672_v61  ;;  %v2600_v7 = vld [vmem:[#allocation2 + $0x10] sm:$0xf] }
  0x24   :  { %913 = vmatpush.bf16.msra.mxu1 %v2689_v45  ;;  %v2800_v2 = vld [vmem:[#allocation2 + $0x1a0] sm:$0xf]  ;;  %v3859_v3 = vld [vmem:[#allocation2 + $0x1a4] sm:$0xf0]  ;;  %v2737_v6 = vor.u32 %v3843_v1, %v2736_v0  ;;  %v3809_v8 = vld [vmem:[#allocation2 + $0x14] sm:$0xf0] }
  0x25   :  { %926 = vmatpush.bf16.msra.mxu2 %v2753_v46  ;;  %v2664_v9 = vld [vmem:[#allocation2 + $0x90] sm:$0xf]  ;;  %v2801_v10 = vor.u32 %v3859_v3, %v2800_v2  ;;  %v3825_v11 = vld [vmem:[#allocation2 + $0x94] sm:$0xf0]  ;;  %v2601_v16 = vor.u32 %v3809_v8, %v2600_v7  ;;  %v2592_v17 = vld [vmem:[#allocation2] sm:$0xf] }
  0x26   :  { %939 = vmatpush.bf16.msra.mxu3 %v2817_v50  ;;  %v2728_v12 = vld [vmem:[#allocation2 + $0x110] sm:$0xf]  ;;  %v3841_v13 = vld [vmem:[#allocation2 + $0x114] sm:$0xf0]  ;;  %v3807_v18 = vld [vmem:[#allocation2 + $0x4] sm:$0xf0]  ;;  %v2665_v19 = vor.u32 %v3825_v11, %v2664_v9 }
  0x27   :  { %901 = vmatpush.bf16.msra.mxu0 %v2617_v56  ;;  %v2792_v14 = vld [vmem:[#allocation2 + $0x190] sm:$0xf]  ;;  %v3857_v15 = vld [vmem:[#allocation2 + $0x194] sm:$0xf0]  ;;  %v2729_v20 = vor.u32 %v3841_v13, %v2728_v12  ;;  %v2656_v21 = vld [vmem:[#allocation2 + $0x80] sm:$0xf]  ;;  %v2593_v31 = vor.u32 %v3807_v18, %v2592_v17 }
  0x28   :  { %914 = vmatpush.bf16.msra.mxu1 %v2681_v57  ;;  %v3823_v22 = vld [vmem:[#allocation2 + $0x84] sm:$0xf0]  ;;  %v2720_v23 = vld [vmem:[#allocation2 + $0x100] sm:$0xf]  ;;  %v2793_v24 = vor.u32 %v3857_v15, %v2792_v14  ;;  %v2904_v28 = vld [vmem:[#allocation2 + $0x270] sm:$0xf] }
  0x29   :  { %927 = vmatpush.bf16.msra.mxu2 %v2745_v58  ;;  %v3839_v25 = vld [vmem:[#allocation2 + $0x104] sm:$0xf0]  ;;  %v2784_v26 = vld [vmem:[#allocation2 + $0x180] sm:$0xf]  ;;  %v3885_v29 = vld [vmem:[#allocation2 + $0x274] sm:$0xf0]  ;;  %v2657_v35 = vor.u32 %v3823_v22, %v2656_v21 }
  0x2a   :  { %940 = vmatpush.bf16.msra.mxu3 %v2809_v62  ;;  %v3855_v27 = vld [vmem:[#allocation2 + $0x184] sm:$0xf0]  ;;  %v2968_v30 = vld [vmem:[#allocation2 + $0x2f0] sm:$0xf]  ;;  %v3901_v32 = vld [vmem:[#allocation2 + $0x2f4] sm:$0xf0]  ;;  %v2721_v36 = vor.u32 %v3839_v25, %v2720_v23  ;;  %v2905_v40 = vor.u32 %v3885_v29, %v2904_v28 }
  0x2b   :  { %902 = vmatpush.bf16.msra.mxu0 %v2609_v4  ;;  %v3032_v33 = vld [vmem:[#allocation2 + $0x370] sm:$0xf]  ;;  %v3917_v34 = vld [vmem:[#allocation2 + $0x374] sm:$0xf0]  ;;  %v2785_v39 = vor.u32 %v3855_v27, %v2784_v26  ;;  %v2969_v41 = vor.u32 %v3901_v32, %v2968_v30  ;;  %v2896_v43 = vld [vmem:[#allocation2 + $0x260] sm:$0xf] }
  0x2c   :  { %915 = vmatpush.bf16.msra.mxu1 %v2673_v5  ;;  %v3096_v37 = vld [vmem:[#allocation2 + $0x3f0] sm:$0xf]  ;;  %v3933_v38 = vld [vmem:[#allocation2 + $0x3f4] sm:$0xf0]  ;;  %v3033_v42 = vor.u32 %v3917_v34, %v3032_v33  ;;  %v3883_v44 = vld [vmem:[#allocation2 + $0x264] sm:$0xf0] }
  0x2d   :  { %928 = vmatpush.bf16.msra.mxu2 %v2737_v6  ;;  %v2960_v45 = vld [vmem:[#allocation2 + $0x2e0] sm:$0xf]  ;;  %v3097_v46 = vor.u32 %v3933_v38, %v3096_v37  ;;  %v3899_v47 = vld [vmem:[#allocation2 + $0x2e4] sm:$0xf0]  ;;  %v109_v52 = vld [vmem:[%s4555_s0 + $0x10] sm:$0xff]  ;;  %v2897_v53 = vor.u32 %v3883_v44, %v2896_v43 }
  0x2e   :  { %941 = vmatpush.bf16.msra.mxu3 %v2801_v10  ;;  %v3024_v48 = vld [vmem:[#allocation2 + $0x360] sm:$0xf]  ;;  %v3915_v49 = vld [vmem:[#allocation2 + $0x364] sm:$0xf0]  ;;  %v2888_v54 = vld [vmem:[#allocation2 + $0x250] sm:$0xf]  ;;  %v4320_v57 = vpack.c.bf16 %v109_v52, %v109_v52  ;;  %v2961_v58 = vor.u32 %v3899_v47, %v2960_v45 }
  0x2f   :  { %903 = vmatpush.bf16.msra.mxu0 %v2601_v16  ;;  %v3088_v50 = vld [vmem:[#allocation2 + $0x3e0] sm:$0xf]  ;;  %v3931_v51 = vld [vmem:[#allocation2 + $0x3e4] sm:$0xf0]  ;;  %v3881_v55 = vld [vmem:[#allocation2 + $0x254] sm:$0xf0]  ;;  %v3025_v59 = vor.u32 %v3915_v49, %v3024_v48 }
  0x30   :  { %916 = vmatpush.bf16.msra.mxu1 %v2665_v19  ;;  %v2952_v56 = vld [vmem:[#allocation2 + $0x2d0] sm:$0xf]  ;;  %v3897_v60 = vld [vmem:[#allocation2 + $0x2d4] sm:$0xf0]  ;;  %v3089_v63 = vor.u32 %v3931_v51, %v3088_v50  ;;  %v107_v0 = vld [vmem:[%s4555_s0] sm:$0xff]  ;;  %v2889_v8 = vor.u32 %v3881_v55, %v2888_v54 }
  0x31   :  { %929 = vmatpush.bf16.msra.mxu2 %v2729_v20  ;;  %v3016_v61 = vld [vmem:[#allocation2 + $0x350] sm:$0xf]  ;;  %v3913_v62 = vld [vmem:[#allocation2 + $0x354] sm:$0xf0]  ;;  %v108_v2 = vld [vmem:[%s4555_s0 + $0x8] sm:$0xff]  ;;  %v4332_v5 = vpack.c.bf16 %v107_v0, %v107_v0  ;;  %v2953_v9 = vor.u32 %v3897_v60, %v2952_v56 }
  0x32   :  { %942 = vmatpush.bf16.msra.mxu3 %v2793_v24  ;;  %v110_v1 = vld [vmem:[%s4555_s0 + $0x18] sm:$0xff]  ;;  %v3080_v3 = vld [vmem:[#allocation2 + $0x3d0] sm:$0xf]  ;;  %v4336_v7 = vpack.c.bf16 %v108_v2, %v108_v2  ;;  %v3017_v10 = vor.u32 %v3913_v62, %v3016_v61  ;;  %v2880_v11 = vld [vmem:[#allocation2 + $0x240] sm:$0xf] }
  0x33   :  { %904 = vmatpush.bf16.msra.mxu0 %v2593_v31  ;;  %v3929_v4 = vld [vmem:[#allocation2 + $0x3d4] sm:$0xf0]  ;;  %v4334_v6 = vpack.c.bf16 %v110_v1, %v110_v1  ;;  %v3879_v12 = vld [vmem:[#allocation2 + $0x244] sm:$0xf0]  ;;  %v2944_v13 = vld [vmem:[#allocation2 + $0x2c0] sm:$0xf] }
  0x34   :  { %917 = vmatpush.bf16.msra.mxu1 %v2657_v35  ;;  %v3081_v14 = vor.u32 %v3929_v4, %v3080_v3  ;;  %v3895_v15 = vld [vmem:[#allocation2 + $0x2c4] sm:$0xf0]  ;;  %v3008_v16 = vld [vmem:[#allocation2 + $0x340] sm:$0xf]  ;;  %v2881_v20 = vor.u32 %v3879_v12, %v2880_v11  ;;  %v2872_v23 = vld [vmem:[#allocation2 + $0x230] sm:$0xf] }
  0x35   :  { %930 = vmatpush.bf16.msra.mxu2 %v2721_v36  ;;  %v3911_v17 = vld [vmem:[#allocation2 + $0x344] sm:$0xf0]  ;;  %v3072_v18 = vld [vmem:[#allocation2 + $0x3c0] sm:$0xf]  ;;  %v2945_v21 = vor.u32 %v3895_v15, %v2944_v13  ;;  %v3877_v24 = vld [vmem:[#allocation2 + $0x234] sm:$0xf0] }
  0x36   :  { %943 = vmatpush.bf16.msra.mxu3 %v2785_v39  ;;  %905 = vmatmul.bf16.vlgmr.msra.gmra.mxu0 %v4332_v5  ;;  %v3927_v19 = vld [vmem:[#allocation2 + $0x3c4] sm:$0xf0]  ;;  %v3009_v22 = vor.u32 %v3911_v17, %v3008_v16  ;;  %v2936_v25 = vld [vmem:[#allocation2 + $0x2b0] sm:$0xf]  ;;  %v3893_v27 = vld [vmem:[#allocation2 + $0x2b4] sm:$0xf0]  ;;  %v2873_v32 = vor.u32 %v3877_v24, %v2872_v23 }
  0x37   :  { %949 = vmatpush.bf16.msrb.mxu0 %v2905_v40  ;;  %918 = vmatmul.bf16.vlgmr.msra.gmra.mxu1 %v4336_v7  ;;  %v3073_v26 = vor.u32 %v3927_v19, %v3072_v18  ;;  %v3000_v28 = vld [vmem:[#allocation2 + $0x330] sm:$0xf]  ;;  %v3909_v29 = vld [vmem:[#allocation2 + $0x334] sm:$0xf0]  ;;  %v2937_v33 = vor.u32 %v3893_v27, %v2936_v25  ;;  %v2864_v35 = vld [vmem:[#allocation2 + $0x220] sm:$0xf] }
  0x38   :  { %962 = vmatpush.bf16.msrb.mxu1 %v2969_v41  ;;  %931 = vmatmul.bf16.vlgmr.msra.gmra.mxu2 %v4320_v57  ;;  %v3064_v30 = vld [vmem:[#allocation2 + $0x3b0] sm:$0xf]  ;;  %v3925_v31 = vld [vmem:[#allocation2 + $0x3b4] sm:$0xf0]  ;;  %v3001_v34 = vor.u32 %v3909_v29, %v3000_v28  ;;  %v3875_v36 = vld [vmem:[#allocation2 + $0x224] sm:$0xf0] }
  0x39   :  { %975 = vmatpush.bf16.msrb.mxu2 %v3033_v42  ;;  %944 = vmatmul.bf16.vlgmr.msra.gmra.mxu3 %v4334_v6  ;;  %v2928_v37 = vld [vmem:[#allocation2 + $0x2a0] sm:$0xf]  ;;  %v3065_v38 = vor.u32 %v3925_v31, %v3064_v30  ;;  %v3891_v39 = vld [vmem:[#allocation2 + $0x2a4] sm:$0xf0]  ;;  %v2865_v44 = vor.u32 %v3875_v36, %v2864_v35  ;;  %v2856_v47 = vld [vmem:[#allocation2 + $0x210] sm:$0xf] }
  0x3a   :  { %988 = vmatpush.bf16.msrb.mxu3 %v3097_v46  ;;  %v2992_v40 = vld [vmem:[#allocation2 + $0x320] sm:$0xf]  ;;  %v3907_v41 = vld [vmem:[#allocation2 + $0x324] sm:$0xf0]  ;;  %v2929_v45 = vor.u32 %v3891_v39, %v2928_v37  ;;  %v3873_v48 = vld [vmem:[#allocation2 + $0x214] sm:$0xf0] }
  0x3b   :  { %950 = vmatpush.bf16.msrb.mxu0 %v2897_v53  ;;  %v3056_v42 = vld [vmem:[#allocation2 + $0x3a0] sm:$0xf]  ;;  %v3923_v43 = vld [vmem:[#allocation2 + $0x3a4] sm:$0xf0]  ;;  %v2993_v46 = vor.u32 %v3907_v41, %v2992_v40  ;;  %v2920_v49 = vld [vmem:[#allocation2 + $0x290] sm:$0xf]  ;;  %v2857_v56 = vor.u32 %v3873_v48, %v2856_v47 }
  0x3c   :  { %963 = vmatpush.bf16.msrb.mxu1 %v2961_v58  ;;  %v3057_v50 = vor.u32 %v3923_v43, %v3056_v42  ;;  %v3889_v51 = vld [vmem:[#allocation2 + $0x294] sm:$0xf0]  ;;  %v2984_v52 = vld [vmem:[#allocation2 + $0x310] sm:$0xf]  ;;  %v2848_v58 = vld [vmem:[#allocation2 + $0x200] sm:$0xf] }
  0x3d   :  { %976 = vmatpush.bf16.msrb.mxu2 %v3025_v59  ;;  %v3905_v53 = vld [vmem:[#allocation2 + $0x314] sm:$0xf0]  ;;  %v3048_v54 = vld [vmem:[#allocation2 + $0x390] sm:$0xf]  ;;  %v3871_v59 = vld [vmem:[#allocation2 + $0x204] sm:$0xf0]  ;;  %v2921_v60 = vor.u32 %v3889_v51, %v2920_v49 }
  0x3e   :  { %989 = vmatpush.bf16.msrb.mxu3 %v3089_v63  ;;  %v3921_v55 = vld [vmem:[#allocation2 + $0x394] sm:$0xf0]  ;;  %v2985_v61 = vor.u32 %v3905_v53, %v2984_v52  ;;  %v2912_v62 = vld [vmem:[#allocation2 + $0x280] sm:$0xf]  ;;  %v3887_v63 = vld [vmem:[#allocation2 + $0x284] sm:$0xf0]  ;;  %v2849_v11 = vor.u32 %v3871_v59, %v2848_v58 }
  0x3f   :  { %951 = vmatpush.bf16.msrb.mxu0 %v2889_v8  ;;  %v2976_v0 = vld [vmem:[#allocation2 + $0x300] sm:$0xf]  ;;  %v3049_v1 = vor.u32 %v3921_v55, %v3048_v54  ;;  %v3903_v2 = vld [vmem:[#allocation2 + $0x304] sm:$0xf0]  ;;  %v3820_v8 = vld [vmem:[#allocation2 + $0x74] sm:$0xf]  ;;  %v2913_v15 = vor.u32 %v3887_v63, %v2912_v62 }
  0x40   :  { %964 = vmatpush.bf16.msrb.mxu1 %v2953_v9  ;;  %v3040_v3 = vld [vmem:[#allocation2 + $0x380] sm:$0xf]  ;;  %v3919_v4 = vld [vmem:[#allocation2 + $0x384] sm:$0xf0]  ;;  %v2650_v9 = vld [vmem:[#allocation2 + $0x78] sm:$0xf0]  ;;  %v2977_v16 = vor.u32 %v3903_v2, %v2976_v0 }
  0x41   :  { %977 = vmatpush.bf16.msrb.mxu2 %v3017_v10  ;;  %v3836_v10 = vld [vmem:[#allocation2 + $0xf4] sm:$0xf]  ;;  %v2714_v12 = vld [vmem:[#allocation2 + $0xf8] sm:$0xf0]  ;;  %v3818_v24 = vld [vmem:[#allocation2 + $0x64] sm:$0xf] }
  0x42   :  { %990 = vmatpush.bf16.msrb.mxu3 %v3081_v14  ;;  %v3852_v13 = vld [vmem:[#allocation2 + $0x174] sm:$0xf]  ;;  %v2778_v14 = vld [vmem:[#allocation2 + $0x178] sm:$0xf0]  ;;  %v2717_v25 = vor.u32 %v3836_v10, %v2714_v12  ;;  %v2642_v27 = vld [vmem:[#allocation2 + $0x68] sm:$0xf0] }
  0x43   :  { %952 = vmatpush.bf16.msrb.mxu0 %v2881_v20  ;;  %v3868_v17 = vld [vmem:[#allocation2 + $0x1f4] sm:$0xf]  ;;  %v2842_v18 = vld [vmem:[#allocation2 + $0x1f8] sm:$0xf0]  ;;  %v3041_v20 = vor.u32 %v3919_v4, %v3040_v3  ;;  %v3834_v28 = vld [vmem:[#allocation2 + $0xe4] sm:$0xf]  ;;  %v2645_v39 = vor.u32 %v3818_v24, %v2642_v27 }
  0x44   :  { %965 = vmatpush.bf16.msrb.mxu1 %v2945_v21  ;;  %v113_v19 = vld [vmem:[%s4555_s0 + $0x30] sm:$0xff]  ;;  %v2653_v21 = vor.u32 %v3820_v8, %v2650_v9  ;;  %v114_v23 = vld [vmem:[%s4555_s0 + $0x38] sm:$0xff]  ;;  %v112_v29 = vld [vmem:[%s4555_s0 + $0x28] sm:$0xff]  ;;  %v2845_v30 = vor.u32 %v3868_v17, %v2842_v18 }
  0x45   :  { %978 = vmatpush.bf16.msrb.mxu2 %v3009_v22  ;;  %v111_v22 = vld [vmem:[%s4555_s0 + $0x20] sm:$0xff]  ;;  %v4353_v31 = vpack.c.bf16 %v113_v19, %v113_v19  ;;  %v4357_v36 = vpack.c.bf16 %v114_v23, %v114_v23  ;;  %v4359_v40 = vpack.c.bf16 %v112_v29, %v112_v29  ;;  %v3816_v43 = vld [vmem:[#allocation2 + $0x54] sm:$0xf]  ;;  %v2698_v47 = vld [vmem:[#allocation2 + $0xd8] sm:$0xf0] }
  0x46   :  { %991 = vmatpush.bf16.msrb.mxu3 %v3073_v26  ;;  %v2781_v26 = vor.u32 %v3852_v13, %v2778_v14  ;;  %v4355_v35 = vpack.c.bf16 %v111_v22, %v111_v22  ;;  %v3866_v37 = vld [vmem:[#allocation2 + $0x1e4] sm:$0xf]  ;;  %v3848_v48 = vld [vmem:[#allocation2 + $0x154] sm:$0xf]  ;;  %v2762_v49 = vld [vmem:[#allocation2 + $0x158] sm:$0xf0] }
  0x47   :  { %953 = vmatpush.bf16.msrb.mxu0 %v2873_v32  ;;  %v2706_v32 = vld [vmem:[#allocation2 + $0xe8] sm:$0xf0]  ;;  %v2826_v51 = vld [vmem:[#allocation2 + $0x1d8] sm:$0xf0]  ;;  %v2765_v54 = vor.u32 %v3848_v48, %v2762_v49  ;;  %v3814_v55 = vld [vmem:[#allocation2 + $0x44] sm:$0xf] }
  0x48   :  { %966 = vmatpush.bf16.msrb.mxu1 %v2937_v33  ;;  %v3850_v33 = vld [vmem:[#allocation2 + $0x164] sm:$0xf]  ;;  %v2709_v41 = vor.u32 %v3834_v28, %v2706_v32  ;;  %v2754_v62 = vld [vmem:[#allocation2 + $0x148] sm:$0xf0]  ;;  %v3812_v4 = vld [vmem:[#allocation2 + $0x34] sm:$0xf] }
  0x49   :  { %979 = vmatpush.bf16.msrb.mxu2 %v3001_v34  ;;  %v2770_v34 = vld [vmem:[#allocation2 + $0x168] sm:$0xf0]  ;;  %v3830_v58 = vld [vmem:[#allocation2 + $0xc4] sm:$0xf]  ;;  %v2618_v8 = vld [vmem:[#allocation2 + $0x38] sm:$0xf0] }
  0x4a   :  { %992 = vmatpush.bf16.msrb.mxu3 %v3065_v38  ;;  %v2834_v38 = vld [vmem:[#allocation2 + $0x1e8] sm:$0xf0]  ;;  %v2773_v42 = vor.u32 %v3850_v33, %v2770_v34  ;;  %v3862_v63 = vld [vmem:[#allocation2 + $0x1c4] sm:$0xf]  ;;  %v3828_v9 = vld [vmem:[#allocation2 + $0xb4] sm:$0xf] }
  0x4b   :  { %954 = vmatpush.bf16.msrb.mxu0 %v2865_v44  ;;  %v2634_v44 = vld [vmem:[#allocation2 + $0x58] sm:$0xf0]  ;;  %v2818_v0 = vld [vmem:[#allocation2 + $0x1c8] sm:$0xf0]  ;;  %v3844_v12 = vld [vmem:[#allocation2 + $0x134] sm:$0xf] }
  0x4c   :  { %967 = vmatpush.bf16.msrb.mxu1 %v2929_v45  ;;  %v3832_v45 = vld [vmem:[#allocation2 + $0xd4] sm:$0xf]  ;;  %v2637_v52 = vor.u32 %v3816_v43, %v2634_v44  ;;  %v2821_v10 = vor.u32 %v3862_v63, %v2818_v0  ;;  %v2746_v13 = vld [vmem:[#allocation2 + $0x138] sm:$0xf0]  ;;  %v3810_v19 = vld [vmem:[#allocation2 + $0x24] sm:$0xf] }
  0x4d   :  { %980 = vmatpush.bf16.msrb.mxu2 %v2993_v46  ;;  %v2837_v46 = vor.u32 %v3866_v37, %v2834_v38  ;;  %v2701_v53 = vor.u32 %v3832_v45, %v2698_v47  ;;  %v3860_v14 = vld [vmem:[#allocation2 + $0x1b4] sm:$0xf]  ;;  %v2749_v18 = vor.u32 %v3844_v12, %v2746_v13  ;;  %v2674_v23 = vld [vmem:[#allocation2 + $0xa8] sm:$0xf0]  ;;  %v3842_v24 = vld [vmem:[#allocation2 + $0x124] sm:$0xf] }
  0x4e   :  { %993 = vmatpush.bf16.msrb.mxu3 %v3057_v50  ;;  %v3864_v50 = vld [vmem:[#allocation2 + $0x1d4] sm:$0xf]  ;;  %v2802_v27 = vld [vmem:[#allocation2 + $0x1a8] sm:$0xf0]  ;;  %v2602_v33 = vld [vmem:[#allocation2 + $0x18] sm:$0xf0] }
  0x4f   :  { %955 = vmatpush.bf16.msrb.mxu0 %v2857_v56  ;;  %v2626_v56 = vld [vmem:[#allocation2 + $0x48] sm:$0xf0]  ;;  %v2829_v59 = vor.u32 %v3864_v50, %v2826_v51  ;;  %v3808_v29 = vld [vmem:[#allocation2 + $0x14] sm:$0xf]  ;;  %v2666_v37 = vld [vmem:[#allocation2 + $0x98] sm:$0xf0] }
  0x50   :  { %968 = vmatpush.bf16.msrb.mxu1 %v2921_v60  ;;  %v2690_v60 = vld [vmem:[#allocation2 + $0xc8] sm:$0xf0]  ;;  %v3824_v34 = vld [vmem:[#allocation2 + $0x94] sm:$0xf]  ;;  %v2794_v43 = vld [vmem:[#allocation2 + $0x198] sm:$0xf0]  ;;  %v2605_v45 = vor.u32 %v3808_v29, %v2602_v33 }
  0x51   :  { %981 = vmatpush.bf16.msrb.mxu2 %v2985_v61  ;;  %v3846_v61 = vld [vmem:[#allocation2 + $0x144] sm:$0xf]  ;;  %v2693_v2 = vor.u32 %v3830_v58, %v2690_v60  ;;  %v2669_v48 = vor.u32 %v3824_v34, %v2666_v37  ;;  %v2658_v50 = vld [vmem:[#allocation2 + $0x88] sm:$0xf0]  ;;  %v2906_v58 = vld [vmem:[#allocation2 + $0x278] sm:$0xf0] }
  0x52   :  { %994 = vmatpush.bf16.msrb.mxu3 %v3049_v1  ;;  %v2629_v1 = vor.u32 %v3814_v55, %v2626_v56  ;;  %v2757_v3 = vor.u32 %v3846_v61, %v2754_v62  ;;  %v3806_v44 = vld [vmem:[#allocation2 + $0x4] sm:$0xf]  ;;  %v2786_v55 = vld [vmem:[#allocation2 + $0x188] sm:$0xf0]  ;;  %v3884_v56 = vld [vmem:[#allocation2 + $0x274] sm:$0xf] }
  0x53   :  { %956 = vmatpush.bf16.msrb.mxu0 %v2849_v11  ;;  %v2682_v11 = vld [vmem:[#allocation2 + $0xb8] sm:$0xf0]  ;;  %v3822_v47 = vld [vmem:[#allocation2 + $0x84] sm:$0xf]  ;;  %v3916_v62 = vld [vmem:[#allocation2 + $0x374] sm:$0xf] }
  0x54   :  { %969 = vmatpush.bf16.msrb.mxu1 %v2913_v15  ;;  %v2810_v15 = vld [vmem:[#allocation2 + $0x1b8] sm:$0xf0]  ;;  %v2685_v17 = vor.u32 %v3828_v9, %v2682_v11  ;;  %v3838_v51 = vld [vmem:[#allocation2 + $0x104] sm:$0xf]  ;;  %v2661_v0 = vor.u32 %v3822_v47, %v2658_v50  ;;  %v2898_v12 = vld [vmem:[#allocation2 + $0x268] sm:$0xf0] }
  0x55   :  { %982 = vmatpush.bf16.msrb.mxu2 %v2977_v16  ;;  %v2621_v16 = vor.u32 %v3812_v4, %v2618_v8  ;;  %v2813_v22 = vor.u32 %v3860_v14, %v2810_v15  ;;  %v2970_v61 = vld [vmem:[#allocation2 + $0x2f8] sm:$0xf0]  ;;  %v2909_v8 = vor.u32 %v3884_v56, %v2906_v58  ;;  %v3882_v11 = vld [vmem:[#allocation2 + $0x264] sm:$0xf]  ;;  %v2962_v15 = vld [vmem:[#allocation2 + $0x2e8] sm:$0xf0] }
  0x56   :  { %995 = vmatpush.bf16.msrb.mxu3 %v3041_v20  ;;  %957 = vmatmul.bf16.vlgmr.msrb.gmra.mxu0 %v4355_v35  ;;  %v2610_v20 = vld [vmem:[#allocation2 + $0x28] sm:$0xf0]  ;;  %v3034_v63 = vld [vmem:[#allocation2 + $0x378] sm:$0xf0]  ;;  %v3898_v13 = vld [vmem:[#allocation2 + $0x2e4] sm:$0xf] }
  0x57   :  { %1001 = vmatpush.bf16.msra.mxu0 %v2653_v21  ;;  %970 = vmatmul.bf16.vlgmr.msrb.gmra.mxu1 %v4359_v40  ;;  %v3826_v21 = vld [vmem:[#allocation2 + $0xa4] sm:$0xf]  ;;  %v2613_v28 = vor.u32 %v3810_v19, %v2610_v20  ;;  %v3090_v19 = vld [vmem:[#allocation2 + $0x3e8] sm:$0xf0]  ;;  %v2901_v20 = vor.u32 %v3882_v11, %v2898_v12  ;;  %v3018_v29 = vld [vmem:[#allocation2 + $0x358] sm:$0xf0] }
  0x58   :  { %1014 = vmatpush.bf16.msra.mxu1 %v2717_v25  ;;  %983 = vmatmul.bf16.vlgmr.msrb.gmra.mxu2 %v4353_v31  ;;  %v2738_v25 = vld [vmem:[#allocation2 + $0x128] sm:$0xf0]  ;;  %v3876_v47 = vld [vmem:[#allocation2 + $0x234] sm:$0xf]  ;;  %v2858_v12 = vld [vmem:[#allocation2 + $0x218] sm:$0xf0] }
  0x59   :  { %1027 = vmatpush.bf16.msra.mxu2 %v2781_v26  ;;  %996 = vmatmul.bf16.vlgmr.msrb.gmra.mxu3 %v4357_v36  ;;  %v3858_v26 = vld [vmem:[#allocation2 + $0x1a4] sm:$0xf]  ;;  %v2741_v32 = vor.u32 %v3842_v24, %v2738_v25  ;;  %v2890_v24 = vld [vmem:[#allocation2 + $0x258] sm:$0xf0]  ;;  %v3896_v25 = vld [vmem:[#allocation2 + $0x2d4] sm:$0xf] }
  0x5a   :  { %1040 = vmatpush.bf16.msra.mxu3 %v2845_v30  ;;  %v2677_v30 = vor.u32 %v3826_v21, %v2674_v23  ;;  %v2805_v38 = vor.u32 %v3858_v26, %v2802_v27  ;;  %v2965_v21 = vor.u32 %v3898_v13, %v2962_v15  ;;  %v3880_v23 = vld [vmem:[#allocation2 + $0x254] sm:$0xf]  ;;  %v2954_v27 = vld [vmem:[#allocation2 + $0x2d8] sm:$0xf0] }
  0x5b   :  { %1002 = vmatpush.bf16.msra.mxu0 %v2645_v39  ;;  %v3840_v39 = vld [vmem:[#allocation2 + $0x114] sm:$0xf]  ;;  %v2893_v33 = vor.u32 %v3880_v23, %v2890_v24  ;;  %v2957_v34 = vor.u32 %v3896_v25, %v2954_v27  ;;  %v2922_v15 = vld [vmem:[#allocation2 + $0x298] sm:$0xf0]  ;;  %v3870_v23 = vld [vmem:[#allocation2 + $0x204] sm:$0xf] }
  0x5c   :  { %1015 = vmatpush.bf16.msra.mxu1 %v2709_v41  ;;  %v2730_v41 = vld [vmem:[#allocation2 + $0x118] sm:$0xf0]  ;;  %v3872_v11 = vld [vmem:[#allocation2 + $0x214] sm:$0xf]  ;;  %v2850_v24 = vld [vmem:[#allocation2 + $0x208] sm:$0xf0] }
  0x5d   :  { %1028 = vmatpush.bf16.msra.mxu2 %v2773_v42  ;;  %v3856_v42 = vld [vmem:[#allocation2 + $0x194] sm:$0xf]  ;;  %v2733_v49 = vor.u32 %v3840_v39, %v2730_v41  ;;  %v2882_v39 = vld [vmem:[#allocation2 + $0x248] sm:$0xf0]  ;;  %v3886_v25 = vld [vmem:[#allocation2 + $0x284] sm:$0xf] }
  0x5e   :  { %1041 = vmatpush.bf16.msra.mxu3 %v2837_v46  ;;  %v2594_v46 = vld [vmem:[#allocation2 + $0x8] sm:$0xf0]  ;;  %v3888_v13 = vld [vmem:[#allocation2 + $0x294] sm:$0xf] }
  0x5f   :  { %1003 = vmatpush.bf16.msra.mxu0 %v2637_v52  ;;  %v2722_v52 = vld [vmem:[#allocation2 + $0x108] sm:$0xf0]  ;;  %v2597_v60 = vor.u32 %v3806_v44, %v2594_v46 }
  0x60   :  { %1016 = vmatpush.bf16.msra.mxu1 %v2701_v53  ;;  %v2797_v53 = vor.u32 %v3856_v42, %v2794_v43  ;;  %v2946_v42 = vld [vmem:[#allocation2 + $0x2c8] sm:$0xf0]  ;;  %v3910_v43 = vld [vmem:[#allocation2 + $0x344] sm:$0xf] }
  0x61   :  { %1029 = vmatpush.bf16.msra.mxu2 %v2765_v54  ;;  %v3854_v54 = vld [vmem:[#allocation2 + $0x184] sm:$0xf]  ;;  %v3010_v44 = vld [vmem:[#allocation2 + $0x348] sm:$0xf0] }
  0x62   :  { %1042 = vmatpush.bf16.msra.mxu3 %v2829_v59  ;;  %v3900_v59 = vld [vmem:[#allocation2 + $0x2f4] sm:$0xf]  ;;  %v2789_v4 = vor.u32 %v3854_v54, %v2786_v55  ;;  %v3066_v55 = vld [vmem:[#allocation2 + $0x3b8] sm:$0xf0]  ;;  %v2914_v27 = vld [vmem:[#allocation2 + $0x288] sm:$0xf0] }
  0x63   :  { %1004 = vmatpush.bf16.msra.mxu0 %v2629_v1  ;;  %v2725_v1 = vor.u32 %v3838_v51, %v2722_v52  ;;  %v2973_v9 = vor.u32 %v3900_v59, %v2970_v61  ;;  %v2938_v51 = vld [vmem:[#allocation2 + $0x2b8] sm:$0xf0]  ;;  %v3908_v52 = vld [vmem:[#allocation2 + $0x334] sm:$0xf]  ;;  %v2866_v61 = vld [vmem:[#allocation2 + $0x228] sm:$0xf0] }
  0x64   :  { %1017 = vmatpush.bf16.msra.mxu1 %v2693_v2  ;;  %v3932_v2 = vld [vmem:[#allocation2 + $0x3f4] sm:$0xf] }
  0x65   :  { %1030 = vmatpush.bf16.msra.mxu2 %v2757_v3  ;;  %v3098_v3 = vld [vmem:[#allocation2 + $0x3f8] sm:$0xf0]  ;;  %v3924_v54 = vld [vmem:[#allocation2 + $0x3b4] sm:$0xf] }
  0x66   :  { %1043 = vmatpush.bf16.msra.mxu3 %v2821_v10  ;;  %v3037_v10 = vor.u32 %v3916_v62, %v3034_v63  ;;  %v3101_v14 = vor.u32 %v3932_v2, %v3098_v3  ;;  %v3890_v62 = vld [vmem:[#allocation2 + $0x2a4] sm:$0xf]  ;;  %v3069_v63 = vor.u32 %v3924_v54, %v3066_v55  ;;  %v2994_v2 = vld [vmem:[#allocation2 + $0x328] sm:$0xf0] }
  0x67   :  { %1005 = vmatpush.bf16.msra.mxu0 %v2621_v16  ;;  %v3914_v16 = vld [vmem:[#allocation2 + $0x364] sm:$0xf] }
  0x68   :  { %1018 = vmatpush.bf16.msra.mxu1 %v2685_v17  ;;  %v3026_v17 = vld [vmem:[#allocation2 + $0x368] sm:$0xf0]  ;;  %v3922_v3 = vld [vmem:[#allocation2 + $0x3a4] sm:$0xf] }
  0x69   :  { %1031 = vmatpush.bf16.msra.mxu2 %v2749_v18  ;;  %v3930_v18 = vld [vmem:[#allocation2 + $0x3e4] sm:$0xf] }
  0x6a   :  { %1044 = vmatpush.bf16.msra.mxu3 %v2813_v22  ;;  %v3029_v22 = vor.u32 %v3914_v16, %v3026_v17  ;;  %v3093_v26 = vor.u32 %v3930_v18, %v3090_v19  ;;  %v3904_v16 = vld [vmem:[#allocation2 + $0x314] sm:$0xf]  ;;  %v2986_v17 = vld [vmem:[#allocation2 + $0x318] sm:$0xf0] }
  0x6b   :  { %1006 = vmatpush.bf16.msra.mxu0 %v2613_v28  ;;  %v3912_v28 = vld [vmem:[#allocation2 + $0x354] sm:$0xf]  ;;  %v3050_v19 = vld [vmem:[#allocation2 + $0x398] sm:$0xf0] }
  0x6c   :  { %1019 = vmatpush.bf16.msra.mxu1 %v2677_v30  ;;  %v3928_v30 = vld [vmem:[#allocation2 + $0x3d4] sm:$0xf]  ;;  %v3021_v37 = vor.u32 %v3912_v28, %v3018_v29  ;;  %v3902_v28 = vld [vmem:[#allocation2 + $0x304] sm:$0xf]  ;;  %v2978_v29 = vld [vmem:[#allocation2 + $0x308] sm:$0xf0] }
  0x6d   :  { %1032 = vmatpush.bf16.msra.mxu2 %v2741_v32  ;;  %v3082_v32 = vld [vmem:[#allocation2 + $0x3d8] sm:$0xf0]  ;;  %v3920_v18 = vld [vmem:[#allocation2 + $0x394] sm:$0xf] }
  0x6e   :  { %1045 = vmatpush.bf16.msra.mxu3 %v2805_v38  ;;  %v3878_v38 = vld [vmem:[#allocation2 + $0x244] sm:$0xf]  ;;  %v3085_v41 = vor.u32 %v3928_v30, %v3082_v32  ;;  %v3042_v32 = vld [vmem:[#allocation2 + $0x388] sm:$0xf0] }
  0x6f   :  { %1007 = vmatpush.bf16.msra.mxu0 %v2605_v45  ;;  %v3926_v45 = vld [vmem:[#allocation2 + $0x3c4] sm:$0xf] }
  0x70   :  { %1020 = vmatpush.bf16.msra.mxu1 %v2669_v48  ;;  %v2874_v48 = vld [vmem:[#allocation2 + $0x238] sm:$0xf0]  ;;  %v3918_v30 = vld [vmem:[#allocation2 + $0x384] sm:$0xf] }
  0x71   :  { %1033 = vmatpush.bf16.msra.mxu2 %v2733_v49  ;;  %v3892_v49 = vld [vmem:[#allocation2 + $0x2b4] sm:$0xf]  ;;  %v2877_v56 = vor.u32 %v3876_v47, %v2874_v48 }
  0x72   :  { %1046 = vmatpush.bf16.msra.mxu3 %v2797_v53  ;;  %v3002_v53 = vld [vmem:[#allocation2 + $0x338] sm:$0xf0]  ;;  %v2941_v58 = vor.u32 %v3892_v49, %v2938_v51 }
  0x73   :  { %1008 = vmatpush.bf16.msra.mxu0 %v2597_v60  ;;  %v3005_v59 = vor.u32 %v3908_v52, %v3002_v53  ;;  %v3874_v60 = vld [vmem:[#allocation2 + $0x224] sm:$0xf] }
  0x74   :  { %1021 = vmatpush.bf16.msra.mxu1 %v2661_v0  ;;  %v2930_v0 = vld [vmem:[#allocation2 + $0x2a8] sm:$0xf0] }
  0x75   :  { %1034 = vmatpush.bf16.msra.mxu2 %v2725_v1  ;;  %v3906_v1 = vld [vmem:[#allocation2 + $0x324] sm:$0xf] }
  0x76   :  { %1047 = vmatpush.bf16.msra.mxu3 %v2789_v4  ;;  %1009 = vmatmul.bf16.vlgmr.msra.gmra.mxu0 %v4332_v5  ;;  %v3074_v5 = vld [vmem:[#allocation2 + $0x3c8] sm:$0xf0] }
  0x77   :  { %1053 = vmatpush.bf16.msrb.mxu0 %v2909_v8  ;;  %1022 = vmatmul.bf16.vlgmr.msra.gmra.mxu1 %v4336_v7  ;;  %v3013_v7 = vor.u32 %v3910_v43, %v3010_v44  ;;  %v3077_v50 = vor.u32 %v3926_v45, %v3074_v5  ;;  %v3058_v4 = vld [vmem:[#allocation2 + $0x3a8] sm:$0xf0]  ;;  %v2869_v8 = vor.u32 %v3874_v60, %v2866_v61  ;;  %v3937_v43 = vld [vmem:[#allocation4 + $0x18] sm:$0xff]  ;;  %v3936_v44 = vld [vmem:[#allocation4 + $0x10] sm:$0xff] }
  0x78   :  { %1066 = vmatpush.bf16.msrb.mxu1 %v2973_v9  ;;  %1035 = vmatmul.bf16.vlgmr.msra.gmra.mxu2 %v4320_v57  ;;  %v3894_v57 = vld [vmem:[#allocation2 + $0x2c4] sm:$0xf]  ;;  %v2933_v9 = vor.u32 %v3890_v62, %v2930_v0  ;;  %v3949_v62 = vld [vmem:[#allocation4 + $0x78] sm:$0xff] }
  0x79   :  { %1079 = vmatpush.bf16.msrb.mxu2 %v3037_v10  ;;  %1048 = vmatmul.bf16.vlgmr.msra.gmra.mxu3 %v4334_v6  ;;  %v2885_v6 = vor.u32 %v3878_v38, %v2882_v39  ;;  %v2949_v46 = vor.u32 %v3894_v57, %v2946_v42  ;;  %v2997_v10 = vor.u32 %v3906_v1, %v2994_v2  ;;  %v3941_v39 = vld [vmem:[#allocation4 + $0x38] sm:$0xff]  ;;  %v3940_v57 = vld [vmem:[#allocation4 + $0x30] sm:$0xff]  ;;  %v3938_v42 = vld [vmem:[#allocation4 + $0x20] sm:$0xff] }
  0x7a   :  { %1092 = vmatpush.bf16.msrb.mxu3 %v3101_v14  ;;  %v3061_v14 = vor.u32 %v3922_v3, %v3058_v4  ;;  %v3045_v38 = vor.u32 %v3918_v30, %v3042_v32  ;;  %v3948_v1 = vld [vmem:[#allocation4 + $0x70] sm:$0xff] }
  0x7b   :  { %1054 = vmatpush.bf16.msrb.mxu0 %v2901_v20  ;;  %v2861_v20 = vor.u32 %v3872_v11, %v2858_v12  ;;  %v3946_v12 = vld [vmem:[#allocation4 + $0x60] sm:$0xff] }
  0x7c   :  { %1067 = vmatpush.bf16.msrb.mxu1 %v2965_v21  ;;  %v2925_v21 = vor.u32 %v3888_v13, %v2922_v15  ;;  %v3945_v13 = vld [vmem:[#allocation4 + $0x58] sm:$0xff] }
  0x7d   :  { %1080 = vmatpush.bf16.msrb.mxu2 %v3029_v22  ;;  %v2989_v22 = vor.u32 %v3904_v16, %v2986_v17 }
  0x7e   :  { %1093 = vmatpush.bf16.msrb.mxu3 %v3093_v26  ;;  %v3053_v26 = vor.u32 %v3920_v18, %v3050_v19  ;;  %v3943_v18 = vld [vmem:[#allocation4 + $0x48] sm:$0xff] }
  0x7f   :  { %1055 = vmatpush.bf16.msrb.mxu0 %v2893_v33  ;;  %v2853_v33 = vor.u32 %v3870_v23, %v2850_v24 }
  0x80   :  { %1068 = vmatpush.bf16.msrb.mxu1 %v2957_v34  ;;  %v2917_v34 = vor.u32 %v3886_v25, %v2914_v27 }
  0x81   :  { %1081 = vmatpush.bf16.msrb.mxu2 %v3021_v37  ;;  %v2981_v37 = vor.u32 %v3902_v28, %v2978_v29 }
  0x82   :  { %1094 = vmatpush.bf16.msrb.mxu3 %v3085_v41  ;;  %v3939_v41 = vld [vmem:[#allocation4 + $0x28] sm:$0xff] }
  0x83   :  { %1056 = vmatpush.bf16.msrb.mxu0 %v2885_v6 }
  0x84   :  { %1069 = vmatpush.bf16.msrb.mxu1 %v2949_v46 }
  0x85   :  { %1082 = vmatpush.bf16.msrb.mxu2 %v3013_v7  ;;  %v3934_v7 = vld [vmem:[#allocation4] sm:$0xff] }
  0x86   :  { %1095 = vmatpush.bf16.msrb.mxu3 %v3077_v50 }
  0x87   :  { %1057 = vmatpush.bf16.msrb.mxu0 %v2877_v56 }
  0x88   :  { %1070 = vmatpush.bf16.msrb.mxu1 %v2941_v58 }
  0x89   :  { %1083 = vmatpush.bf16.msrb.mxu2 %v3005_v59 }
  0x8a   :  { %1096 = vmatpush.bf16.msrb.mxu3 %v3069_v63 }
  0x8b   :  { %1058 = vmatpush.bf16.msrb.mxu0 %v2869_v8  ;;  %v3947_v8 = vld [vmem:[#allocation4 + $0x68] sm:$0xff] }
  0x8c   :  { %1071 = vmatpush.bf16.msrb.mxu1 %v2933_v9 }
  0x8d   :  { %1084 = vmatpush.bf16.msrb.mxu2 %v2997_v10 }
  0x8e   :  { %1097 = vmatpush.bf16.msrb.mxu3 %v3061_v14  ;;  %v3944_v14 = vld [vmem:[#allocation4 + $0x50] sm:$0xff] }
  0x8f   :  { %1059 = vmatpush.bf16.msrb.mxu0 %v2861_v20 }
  0x90   :  { %1072 = vmatpush.bf16.msrb.mxu1 %v2925_v21 }
  0x91   :  { %1085 = vmatpush.bf16.msrb.mxu2 %v2989_v22  ;;  %v3942_v22 = vld [vmem:[#allocation4 + $0x40] sm:$0xff] }
  0x92   :  { %1098 = vmatpush.bf16.msrb.mxu3 %v3053_v26 }
  0x93   :  { %1060 = vmatpush.bf16.msrb.mxu0 %v2853_v33 }
  0x94   :  { %1073 = vmatpush.bf16.msrb.mxu1 %v2917_v34 }
  0x95   :  { %1086 = vmatpush.bf16.msrb.mxu2 %v2981_v37 }
  0x96   :  { %1099 = vmatpush.bf16.msrb.mxu3 %v3045_v38  ;;  %1061 = vmatmul.bf16.vlgmr.msrb.gmra.mxu0 %v4355_v35  ;;  %v3935_v35 = vld [vmem:[#allocation4 + $0x8] sm:$0xff] }
  0x97   :  { %1245 = vmatpush.bf16.msra.mxu0 %v3941_v39  ;;  %1074 = vmatmul.bf16.vlgmr.msrb.gmra.mxu1 %v4359_v40 }
  0x98   :  { %1087 = vmatmul.bf16.vlgmr.msrb.gmra.mxu2 %v4353_v31  ;;  %v251_v31 = vld [vmem:[%s4557_s2] sm:$0x3]  ;;  %1258 = vmatpush.bf16.msra.mxu1 %v3949_v62 }
  0x99   :  { %1100 = vmatmul.bf16.vlgmr.msrb.gmra.mxu3 %v4357_v36  ;;  %v253_v40 = vperm.slane %v251_v31, 0  ;;  %v254_v23 = vperm.slane %v251_v31, 1  ;;  %v3956_v31 = vld [vmem:[#allocation6 + $0x30] sm:$0xff] }
  0x9b   :  { %1246 = vmatpush.bf16.msra.mxu0 %v3940_v57 }
  0x9c   :  { %1259 = vmatpush.bf16.msra.mxu1 %v3948_v1 }
  0x9f   :  { %1247 = vmatpush.bf16.msra.mxu0 %v3939_v41 }
  0xa0   :  { %1260 = vmatpush.bf16.msra.mxu1 %v3947_v8  ;;  %v3981_v8 = vld [vmem:[%s4564_s9 + $0x74] sm:$0xf0] }
  0xa3   :  { %1248 = vmatpush.bf16.msra.mxu0 %v3938_v42 }
  0xa4   :  { %1261 = vmatpush.bf16.msra.mxu1 %v3946_v12  ;;  %v3280_v12 = vld [vmem:[%s4564_s9 + $0x60] sm:$0xf] }
  0xa7   :  { %1249 = vmatpush.bf16.msra.mxu0 %v3937_v43 }
  0xa8   :  { %1262 = vmatpush.bf16.msra.mxu1 %v3945_v13  ;;  %v3979_v13 = vld [vmem:[%s4564_s9 + $0x64] sm:$0xf0] }
  0xab   :  { %1250 = vmatpush.bf16.msra.mxu0 %v3936_v44 }
  0xac   :  { %1263 = vmatpush.bf16.msra.mxu1 %v3944_v14 }
  0xaf   :  { %1251 = vmatpush.bf16.msra.mxu0 %v3935_v35  ;;  %v3957_v35 = vld [vmem:[#allocation6 + $0x38] sm:$0xff] }
  0xb0   :  { %1264 = vmatpush.bf16.msra.mxu1 %v3943_v18  ;;  %1343 = vmatpush.bf16.msra.mxu2 %v3957_v35 }
  0xb3   :  { %v906_v45 = vpop.f32.mrf.mxu0  ;;  %1252 = vmatpush.bf16.msra.mxu0 %v3934_v7  ;;  %v3952_v7 = vld [vmem:[#allocation6 + $0x10] sm:$0xff] }
  0xb4   :  { %v919_v5 = vpop.f32.mrf.mxu1  ;;  %v907_v49 = vadd.f32 %v906_v45, %v253_v40  ;;  %1265 = vmatpush.bf16.msra.mxu1 %v3942_v22  ;;  %1344 = vmatpush.bf16.msra.mxu2 %v3956_v31  ;;  %v3954_v40 = vld [vmem:[#allocation6 + $0x20] sm:$0xff]  ;;  %v3274_v22 = vld [vmem:[%s4564_s9 + $0x58] sm:$0xf0] }
  0xb6   :  { %v920_v51 = vadd.f32 %v919_v5, %v907_v49  ;;  %v3951_v49 = vld [vmem:[#allocation6 + $0x8] sm:$0xff] }
  0xbb   :  { %v932_v6 = vpop.f32.mrf.mxu2  ;;  %v908_v46 = vpop.f32.mrf.mxu0 }
  0xbc   :  { %v945_v36 = vpop.f32.mrf.mxu3  ;;  %v921_v47 = vpop.f32.mrf.mxu1  ;;  %v933_v52 = vadd.f32 %v932_v6, %v920_v51  ;;  %v3953_v46 = vld [vmem:[#allocation6 + $0x18] sm:$0xff] }
  0xbd   :  { %v3965_v51 = vld [vmem:[%s4562_s7 + $0x38] sm:$0xff] }
  0xbe   :  { %v946_v53 = vadd.f32 %v945_v36, %v933_v52  ;;  %v3955_v36 = vld [vmem:[#allocation6 + $0x28] sm:$0xff]  ;;  %1428 = vmatpush.bf16.msra.mxu3 %v3965_v51  ;;  %v3964_v52 = vld [vmem:[%s4562_s7 + $0x30] sm:$0xff] }
  0xbf   :  { %1345 = vmatpush.bf16.msra.mxu2 %v3955_v36 }
  0xc2   :  { %1429 = vmatpush.bf16.msra.mxu3 %v3964_v52  ;;  %v3232_v52 = vld [vmem:[%s4564_s9] sm:$0xf] }
  0xc3   :  { %v934_v48 = vpop.f32.mrf.mxu2  ;;  %1346 = vmatpush.bf16.msra.mxu2 %v3954_v40 }
  0xc4   :  { %v947_v50 = vpop.f32.mrf.mxu3 }
  0xc5   :  { %v3950_v50 = vld [vmem:[#allocation6] sm:$0xff] }
  0xc7   :  { %1347 = vmatpush.bf16.msra.mxu2 %v3953_v46 }
  0xcb   :  { %1348 = vmatpush.bf16.msra.mxu2 %v3952_v7  ;;  %v3240_v7 = vld [vmem:[%s4564_s9 + $0x10] sm:$0xf] }
  0xcf   :  { %1349 = vmatpush.bf16.msra.mxu2 %v3951_v49 }
  0xd3   :  { %v958_v54 = vpop.f32.mrf.mxu0  ;;  %1350 = vmatpush.bf16.msra.mxu2 %v3950_v50  ;;  %v3242_v50 = vld [vmem:[%s4564_s9 + $0x18] sm:$0xf0] }
  0xd4   :  { %v959_v55 = vadd.f32 %v958_v54, %v946_v53  ;;  %v971_v56 = vpop.f32.mrf.mxu1  ;;  %v3963_v53 = vld [vmem:[%s4562_s7 + $0x28] sm:$0xff]  ;;  %v3962_v54 = vld [vmem:[%s4562_s7 + $0x20] sm:$0xff] }
  0xd5   :  { %1430 = vmatpush.bf16.msra.mxu3 %v3963_v53  ;;  %v3967_v53 = vld [vmem:[%s4564_s9 + $0x4] sm:$0xf0] }
  0xd6   :  { %v972_v58 = vadd.f32 %v971_v56, %v959_v55  ;;  %v3961_v55 = vld [vmem:[%s4562_s7 + $0x18] sm:$0xff]  ;;  %v3960_v56 = vld [vmem:[%s4562_s7 + $0x10] sm:$0xff] }
  0xd9   :  { %1431 = vmatpush.bf16.msra.mxu3 %v3962_v54  ;;  %v3966_v54 = vld [vmem:[%s4564_s9 + $0x4] sm:$0xf] }
  0xdb   :  { %v984_v59 = vpop.f32.mrf.mxu2  ;;  %v960_v0 = vpop.f32.mrf.mxu0 }
  0xdc   :  { %v985_v60 = vadd.f32 %v984_v59, %v972_v58  ;;  %v997_v61 = vpop.f32.mrf.mxu3  ;;  %v973_v2 = vpop.f32.mrf.mxu1  ;;  %v4120_v58 = vld [vmem:[%s4559_s4] ss:$0 sm:$0xff] }
  0xdd   :  { %1432 = vmatpush.bf16.msra.mxu3 %v3961_v55  ;;  %v3959_v2 = vld [vmem:[%s4562_s7 + $0x8] sm:$0xff]  ;;  %v3233_v55 = vor.u32 %v3967_v53, %v3232_v52  ;;  %v3360_v53 = vld [vmem:[#allocation7 + $0x80] sm:$0xf] }
  0xde   :  { %v998_v63 = vadd.f32 %v997_v61, %v985_v60 }
  0xe0   :  { %vm1105_vm0 = vcmp.gt.f32.partialorder %v998_v63, 0.0  ;;  %v1107_v3 = vmul.f32 0.2, %v998_v63 }
  0xe1   :  { %1433 = vmatpush.bf16.msra.mxu3 %v3960_v56  ;;  %v3234_v56 = vld [vmem:[%s4564_s9 + $0x8] sm:$0xf0] }
  0xe2   :  { %v1109_v4 = vsel %vm1105_vm0, %v998_v63, %v1107_v3  ;;  %v3958_v3 = vld [vmem:[%s4562_s7] sm:$0xff] }
  0xe3   :  { %v1111_v9 = vpack.c.bf16 %v1109_v4, %v1109_v4  ;;  %v986_v10 = vpop.f32.mrf.mxu2  ;;  %v3288_v4 = vld [vmem:[%s4564_s9 + $0x70] sm:$0xf] }
  0xe4   :  { %v999_v11 = vpop.f32.mrf.mxu3  ;;  %v3289_v10 = vor.u32 %v3981_v8, %v3288_v4  ;;  %v4102_v4 = vld [vmem:[#allocation7 + $0x3c4] sm:$0xf] }
  0xe5   :  { %1253 = vmatmul.bf16.vlgmr.msra.gmra.mxu0 %v1111_v9  ;;  %1434 = vmatpush.bf16.msra.mxu3 %v3959_v2  ;;  %v3980_v9 = vld [vmem:[%s4564_s9 + $0x74] sm:$0xf]  ;;  %v3290_v11 = vld [vmem:[%s4564_s9 + $0x78] sm:$0xf0]  ;;  %v3778_v8 = vld [vmem:[#allocation7 + $0x3e0] sm:$0xf0] }
  0xe6   :  { %v3293_v14 = vor.u32 %v3980_v9, %v3290_v11  ;;  %1547 = vmatpush.bf16.msrb.mxu0 %v3289_v10  ;;  %v3488_v9 = vld [vmem:[#allocation7 + $0x180] sm:$0xf]  ;;  %v3781_v10 = vor.u32 %v4102_v4, %v3778_v8 }
  0xe7   :  { %v4034_v11 = vld [vmem:[#allocation7 + $0x19c] sm:$0xf0] }
  0xe8   :  { %1560 = vmatpush.bf16.msrb.mxu1 %v3293_v14  ;;  %v3489_v14 = vor.u32 %v4034_v11, %v3488_v9  ;;  %v3994_v4 = vld [vmem:[#allocation7 + $0x5c] sm:$0xf0]  ;;  %v3990_v11 = vld [vmem:[#allocation7 + $0x44] sm:$0xf] }
  0xe9   :  { %1435 = vmatpush.bf16.msra.mxu3 %v3958_v3  ;;  %v3584_v8 = vld [vmem:[#allocation7 + $0x240] sm:$0xf] }
  0xf3   :  { %v1010_v15 = vpop.f32.mrf.mxu0 }
  0xf4   :  { %v1023_v16 = vpop.f32.mrf.mxu1  ;;  %v1011_v26 = vadd.f32 %v1010_v15, %v254_v23  ;;  %v3978_v15 = vld [vmem:[%s4564_s9 + $0x64] sm:$0xf] }
  0xf6   :  { %v1024_v27 = vadd.f32 %v1023_v16, %v1011_v26  ;;  %v3282_v16 = vld [vmem:[%s4564_s9 + $0x68] sm:$0xf0]  ;;  %v3975_v26 = vld [vmem:[%s4564_s9 + $0x44] sm:$0xf0] }
  0xf7   :  { %v3285_v18 = vor.u32 %v3978_v15, %v3282_v16  ;;  %v4030_v16 = vld [vmem:[#allocation7 + $0x184] sm:$0xf] }
  0xf9   :  { %1561 = vmatpush.bf16.msrb.mxu1 %v3285_v18  ;;  %v4094_v18 = vld [vmem:[#allocation7 + $0x384] sm:$0xf] }
  0xfb   :  { %v1036_v17 = vpop.f32.mrf.mxu2  ;;  %v1012_v20 = vpop.f32.mrf.mxu0 }
  0xfc   :  { %v1049_v19 = vpop.f32.mrf.mxu3  ;;  %v1025_v21 = vpop.f32.mrf.mxu1  ;;  %v1037_v28 = vadd.f32 %v1036_v17, %v1024_v27  ;;  %v3281_v17 = vor.u32 %v3979_v13, %v3280_v12  ;;  %v3977_v20 = vld [vmem:[%s4564_s9 + $0x54] sm:$0xf0]  ;;  %v3974_v27 = vld [vmem:[%s4564_s9 + $0x44] sm:$0xf]  ;;  %v3744_v12 = vld [vmem:[#allocation7 + $0x380] sm:$0xf] }
  0xfd   :  { %v3976_v21 = vld [vmem:[%s4564_s9 + $0x54] sm:$0xf]  ;;  %v4098_v13 = vld [vmem:[#allocation7 + $0x39c] sm:$0xf0] }
  0xfe   :  { %v1050_v29 = vadd.f32 %v1049_v19, %v1037_v28  ;;  %v3272_v19 = vld [vmem:[%s4564_s9 + $0x50] sm:$0xf]  ;;  %1548 = vmatpush.bf16.msrb.mxu0 %v3281_v17  ;;  %v3266_v28 = vld [vmem:[%s4564_s9 + $0x48] sm:$0xf0]  ;;  %v3745_v15 = vor.u32 %v4098_v13, %v3744_v12  ;;  %v3490_v17 = vld [vmem:[#allocation7 + $0x1a0] sm:$0xf0] }
  0xff   :  { %v3273_v23 = vor.u32 %v3977_v20, %v3272_v19  ;;  %v3493_v19 = vor.u32 %v4030_v16, %v3490_v17  ;;  %v3746_v20 = vld [vmem:[#allocation7 + $0x3a0] sm:$0xf0]  ;;  %v3296_v16 = vld [vmem:[#allocation7] sm:$0xf] }
 0x100   :  { %v3330_v12 = vld [vmem:[#allocation7 + $0x60] sm:$0xf0] }
 0x101   :  { %v4054_v13 = vld [vmem:[#allocation7 + $0x244] sm:$0xf] }
 0x102   :  { %1549 = vmatpush.bf16.msrb.mxu0 %v3273_v23  ;;  %v3749_v23 = vor.u32 %v4094_v18, %v3746_v20  ;;  %v3986_v20 = vld [vmem:[#allocation7 + $0x1c] sm:$0xf0] }
 0x103   :  { %v1038_v24 = vpop.f32.mrf.mxu2 }
 0x104   :  { %v1051_v25 = vpop.f32.mrf.mxu3  ;;  %v3277_v24 = vor.u32 %v3976_v21, %v3274_v22  ;;  %v3456_v21 = vld [vmem:[#allocation7 + $0x140] sm:$0xf] }
 0x105   :  { %v3264_v25 = vld [vmem:[%s4564_s9 + $0x40] sm:$0xf] }
 0x106   :  { %1562 = vmatpush.bf16.msrb.mxu1 %v3277_v24  ;;  %v4026_v22 = vld [vmem:[#allocation7 + $0x15c] sm:$0xf0] }
 0x107   :  { %v3712_v24 = vld [vmem:[#allocation7 + $0x340] sm:$0xf] }
 0x113   :  { %v1062_v30 = vpop.f32.mrf.mxu0 }
 0x114   :  { %v1075_v32 = vpop.f32.mrf.mxu1  ;;  %v1063_v33 = vadd.f32 %v1062_v30, %v1050_v29  ;;  %v3265_v29 = vor.u32 %v3975_v26, %v3264_v25  ;;  %v3269_v30 = vor.u32 %v3974_v27, %v3266_v28  ;;  %v4090_v25 = vld [vmem:[#allocation7 + $0x35c] sm:$0xf0]  ;;  %v4022_v26 = vld [vmem:[#allocation7 + $0x144] sm:$0xf]  ;;  %v3457_v27 = vor.u32 %v4026_v22, %v3456_v21 }
 0x115   :  { %v3458_v28 = vld [vmem:[#allocation7 + $0x160] sm:$0xf0]  ;;  %v3552_v21 = vld [vmem:[#allocation7 + $0x200] sm:$0xf] }
 0x116   :  { %v1076_v34 = vadd.f32 %v1075_v32, %v1063_v33  ;;  %v3256_v32 = vld [vmem:[%s4564_s9 + $0x30] sm:$0xf]  ;;  %v3973_v33 = vld [vmem:[%s4564_s9 + $0x34] sm:$0xf0]  ;;  %1550 = vmatpush.bf16.msrb.mxu0 %v3265_v29  ;;  %1563 = vmatpush.bf16.msrb.mxu1 %v3269_v30  ;;  %v4086_v29 = vld [vmem:[#allocation7 + $0x344] sm:$0xf] }
 0x117   :  { %v3714_v30 = vld [vmem:[#allocation7 + $0x360] sm:$0xf0]  ;;  %v4050_v22 = vld [vmem:[#allocation7 + $0x21c] sm:$0xf0] }
 0x11b   :  { %v1088_v37 = vpop.f32.mrf.mxu2  ;;  %v1064_v57 = vpop.f32.mrf.mxu0 }
 0x11c   :  { %v1089_v38 = vadd.f32 %v1088_v37, %v1076_v34  ;;  %v1101_v39 = vpop.f32.mrf.mxu3  ;;  %v1077_v41 = vpop.f32.mrf.mxu1  ;;  %v3972_v34 = vld [vmem:[%s4564_s9 + $0x34] sm:$0xf]  ;;  %v3258_v37 = vld [vmem:[%s4564_s9 + $0x38] sm:$0xf0]  ;;  %v3248_v57 = vld [vmem:[%s4564_s9 + $0x20] sm:$0xf] }
 0x11d   :  { %v3971_v41 = vld [vmem:[%s4564_s9 + $0x24] sm:$0xf0] }
 0x11e   :  { %v1102_v42 = vadd.f32 %v1101_v39, %v1089_v38  ;;  %v3257_v38 = vor.u32 %v3973_v33, %v3256_v32  ;;  %v3261_v39 = vor.u32 %v3972_v34, %v3258_v37  ;;  %v3713_v32 = vor.u32 %v4090_v25, %v3712_v24  ;;  %v3424_v34 = vld [vmem:[#allocation7 + $0x100] sm:$0xf]  ;;  %v3982_v25 = vld [vmem:[#allocation7 + $0x4] sm:$0xf] }
 0x11f   :  { %v3461_v33 = vor.u32 %v4022_v26, %v3458_v28  ;;  %v4018_v37 = vld [vmem:[#allocation7 + $0x11c] sm:$0xf0]  ;;  %v3298_v26 = vld [vmem:[#allocation7 + $0x20] sm:$0xf0] }
 0x120   :  { %vm1106_vm1 = vcmp.gt.f32.partialorder %v1102_v42, 0.0  ;;  %v1108_v43 = vmul.f32 0.2, %v1102_v42  ;;  %1551 = vmatpush.bf16.msrb.mxu0 %v3257_v38  ;;  %1564 = vmatpush.bf16.msrb.mxu1 %v3261_v39  ;;  %v3680_v38 = vld [vmem:[#allocation7 + $0x300] sm:$0xf]  ;;  %v3717_v39 = vor.u32 %v4086_v29, %v3714_v30 }
 0x121   :  { %v3554_v28 = vld [vmem:[#allocation7 + $0x220] sm:$0xf0]  ;;  %v3528_v29 = vld [vmem:[#allocation7 + $0x1c8] sm:$0xf] }
 0x122   :  { %v1110_v44 = vsel %vm1106_vm1, %v1102_v42, %v1108_v43  ;;  %v3970_v42 = vld [vmem:[%s4564_s9 + $0x24] sm:$0xf]  ;;  %v3250_v43 = vld [vmem:[%s4564_s9 + $0x28] sm:$0xf0]  ;;  %v4043_v30 = vld [vmem:[#allocation7 + $0x1e4] sm:$0xf0] }
 0x123   :  { %v1112_v45 = vpack.c.bf16 %v1110_v44, %v1110_v44  ;;  %v1090_v5 = vpop.f32.mrf.mxu2  ;;  %v3249_v44 = vor.u32 %v3971_v41, %v3248_v57  ;;  %v4082_v57 = vld [vmem:[#allocation7 + $0x31c] sm:$0xf0]  ;;  %v4014_v41 = vld [vmem:[#allocation7 + $0x104] sm:$0xf] }
 0x124   :  { %v1103_v6 = vpop.f32.mrf.mxu3  ;;  %v4121_v5 = vld [vmem:[%s4561_s6] ss:$0 sm:$0xff] }
 0x125   :  { %1266 = vmatmul.bf16.vlgmr.msra.gmra.mxu1 %v1112_v45  ;;  %v3253_v45 = vor.u32 %v3970_v42, %v3250_v43  ;;  %1552 = vmatpush.bf16.msrb.mxu0 %v3249_v44  ;;  %v3426_v42 = vld [vmem:[#allocation7 + $0x120] sm:$0xf0] }
 0x126   :  { %v4078_v43 = vld [vmem:[#allocation7 + $0x304] sm:$0xf] }
 0x127   :  { %1565 = vmatpush.bf16.msrb.mxu1 %v3253_v45  ;;  %v3682_v44 = vld [vmem:[#allocation7 + $0x320] sm:$0xf0]  ;;  %v3425_v45 = vor.u32 %v4018_v37, %v3424_v34  ;;  %v3784_v34 = vld [vmem:[#allocation7 + $0x3c8] sm:$0xf] }
 0x128   :  { %v4107_v37 = vld [vmem:[#allocation7 + $0x3e4] sm:$0xf0] }
 0x162   :  { %v1254_v47 = vpop.f32.mrf.mxu0 }
 0x163   :  { %v1255_v59 = vadd.f32 %v4120_v58, %v1254_v47  ;;  %v3969_v47 = vld [vmem:[%s4564_s9 + $0x14] sm:$0xf0]  ;;  %v3237_v58 = vor.u32 %v3966_v54, %v3234_v56  ;;  %v4002_v54 = vld [vmem:[#allocation7 + $0x9c] sm:$0xf0] }
 0x164   :  { %v3241_v49 = vor.u32 %v3969_v47, %v3240_v7  ;;  %v4006_v7 = vld [vmem:[#allocation7 + $0xc4] sm:$0xf] }
 0x165   :  { %v3394_v47 = vld [vmem:[#allocation7 + $0xe0] sm:$0xf0] }
 0x166   :  { %1553 = vmatpush.bf16.msrb.mxu0 %v3241_v49  ;;  %v3650_v49 = vld [vmem:[#allocation7 + $0x2e0] sm:$0xf0]  ;;  %v3397_v52 = vor.u32 %v4006_v7, %v3394_v47 }
 0x16a   :  { %v1256_v48 = vpop.f32.mrf.mxu0  ;;  %1554 = vmatpush.bf16.msrb.mxu0 %v3233_v55  ;;  %v3616_v55 = vld [vmem:[#allocation7 + $0x280] sm:$0xf] }
 0x16b   :  { %v3968_v48 = vld [vmem:[%s4564_s9 + $0x14] sm:$0xf] }
 0x16c   :  { %v3245_v51 = vor.u32 %v3968_v48, %v3242_v50  ;;  %v4070_v48 = vld [vmem:[#allocation7 + $0x2c4] sm:$0xf] }
 0x16d   :  { %v3653_v56 = vor.u32 %v4070_v48, %v3650_v49  ;;  %v4099_v48 = vld [vmem:[#allocation7 + $0x3a4] sm:$0xf0]  ;;  %v4031_v49 = vld [vmem:[#allocation7 + $0x18c] sm:$0xf] }
 0x16e   :  { %1566 = vmatpush.bf16.msrb.mxu1 %v3245_v51 }
 0x172   :  { %1567 = vmatpush.bf16.msrb.mxu1 %v3237_v58  ;;  %v4066_v58 = vld [vmem:[#allocation7 + $0x29c] sm:$0xf0] }
 0x176   :  { %2406 = vmatpush.bf16.msra.mxu1 %v3781_v10  ;;  %v4058_v10 = vld [vmem:[#allocation7 + $0x25c] sm:$0xf0] }
 0x177   :  { %v3585_v18 = vor.u32 %v4058_v10, %v3584_v8  ;;  %v3432_v8 = vld [vmem:[#allocation7 + $0x108] sm:$0xf] }
 0x178   :  { %v3688_v10 = vld [vmem:[#allocation7 + $0x308] sm:$0xf] }
 0x17a   :  { %2407 = vmatpush.bf16.msra.mxu1 %v3749_v23 }
 0x17e   :  { %2408 = vmatpush.bf16.msra.mxu1 %v3717_v39  ;;  %v3530_v39 = vld [vmem:[#allocation7 + $0x1e8] sm:$0xf0] }
 0x1a2   :  { %v1267_v60 = vpop.f32.mrf.mxu1 }
 0x1a3   :  { %v1268_v61 = vadd.f32 %v1267_v60, %v1255_v59  ;;  %v3520_v59 = vld [vmem:[#allocation7 + $0x1c0] sm:$0xf] }
 0x1a4   :  { %v4042_v60 = vld [vmem:[#allocation7 + $0x1dc] sm:$0xf0] }
 0x1a5   :  { %vm1271_vm2 = vcmp.gt.f32.partialorder %v1268_v61, 0.0  ;;  %v1272_v62 = vmul.f32 0.2, %v1268_v61 }
 0x1a7   :  { %v1273_v63 = vsel %vm1271_vm2, %v1268_v61, %v1272_v62  ;;  %v3776_v61 = vld [vmem:[#allocation7 + $0x3c0] sm:$0xf]  ;;  %v3521_v62 = vor.u32 %v4042_v60, %v3520_v59  ;;  %v3998_v59 = vld [vmem:[#allocation7 + $0x84] sm:$0xf] }
 0x1a8   :  { %v1274_v0 = vpack.c.bf16 %v1273_v63, %v1273_v63  ;;  %v4106_v63 = vld [vmem:[#allocation7 + $0x3dc] sm:$0xf0]  ;;  %v3362_v60 = vld [vmem:[#allocation7 + $0xa0] sm:$0xf0] }
 0x1a9   :  { %v3777_v2 = vor.u32 %v4106_v63, %v3776_v61  ;;  %2367 = vmatpush.bf16.msrb.mxu2 %v3521_v62  ;;  %v4062_v61 = vld [vmem:[#allocation7 + $0x284] sm:$0xf]  ;;  %v4122_v63 = vld [vmem:[%s4563_s8] ss:$0 sm:$0xff] }
 0x1aa   :  { %v1269_v1 = vpop.f32.mrf.mxu1  ;;  %1351 = vmatmul.bf16.vlgmr.msra.gmra.mxu2 %v1274_v0  ;;  %v4038_v0 = vld [vmem:[#allocation7 + $0x1c4] sm:$0xf] }
 0x1ab   :  { %v3522_v1 = vld [vmem:[#allocation7 + $0x1e0] sm:$0xf0]  ;;  %2380 = vmatpush.bf16.msrb.mxu3 %v3777_v2  ;;  %v3365_v2 = vor.u32 %v3998_v59, %v3362_v60  ;;  %v3720_v59 = vld [vmem:[#allocation7 + $0x348] sm:$0xf] }
 0x1ac   :  { %v3525_v3 = vor.u32 %v4038_v0, %v3522_v1  ;;  %v3618_v62 = vld [vmem:[#allocation7 + $0x2a0] sm:$0xf0]  ;;  %v3361_v0 = vor.u32 %v4002_v54, %v3360_v53  ;;  %v3617_v1 = vor.u32 %v4066_v58, %v3616_v55  ;;  %v4027_v58 = vld [vmem:[#allocation7 + $0x164] sm:$0xf0] }
 0x1ad   :  { %2368 = vmatpush.bf16.msrb.mxu2 %v3489_v14  ;;  %v3621_v9 = vor.u32 %v4062_v61, %v3618_v62  ;;  %v3586_v14 = vld [vmem:[#allocation7 + $0x260] sm:$0xf0]  ;;  %v4091_v61 = vld [vmem:[#allocation7 + $0x364] sm:$0xf0]  ;;  %v4023_v62 = vld [vmem:[#allocation7 + $0x14c] sm:$0xf] }
 0x1ae   :  { %2393 = vmatpush.bf16.msra.mxu0 %v3525_v3  ;;  %v3328_v3 = vld [vmem:[#allocation7 + $0x40] sm:$0xf]  ;;  %v3589_v24 = vor.u32 %v4054_v13, %v3586_v14  ;;  %v4015_v13 = vld [vmem:[#allocation7 + $0x10c] sm:$0xf] }
 0x1af   :  { %2381 = vmatpush.bf16.msrb.mxu3 %v3745_v15  ;;  %v3329_v15 = vor.u32 %v3994_v4, %v3328_v3  ;;  %v3721_v3 = vor.u32 %v4091_v61, %v3720_v59  ;;  %v3434_v14 = vld [vmem:[#allocation7 + $0x128] sm:$0xf0] }
 0x1b0   :  { %v3983_v59 = vld [vmem:[#allocation7 + $0xc] sm:$0xf] }
 0x1b1   :  { %2369 = vmatpush.bf16.msrb.mxu2 %v3457_v27  ;;  %v4046_v27 = vld [vmem:[#allocation7 + $0x204] sm:$0xf] }
 0x1b2   :  { %2394 = vmatpush.bf16.msra.mxu0 %v3493_v19  ;;  %v3333_v19 = vor.u32 %v3990_v11, %v3330_v12  ;;  %v4083_v12 = vld [vmem:[#allocation7 + $0x324] sm:$0xf0] }
 0x1b3   :  { %2382 = vmatpush.bf16.msrb.mxu3 %v3713_v32 }
 0x1b5   :  { %2370 = vmatpush.bf16.msrb.mxu2 %v3425_v45 }
 0x1b6   :  { %2395 = vmatpush.bf16.msra.mxu0 %v3461_v33  ;;  %v3297_v33 = vor.u32 %v3986_v20, %v3296_v16  ;;  %v3690_v16 = vld [vmem:[#allocation7 + $0x328] sm:$0xf0]  ;;  %v3400_v20 = vld [vmem:[#allocation7 + $0xc8] sm:$0xf] }
 0x22d   :  { %v1352_v6 = vpop.f32.mrf.mxu2 }
 0x22e   :  { %v1353_v35 = vadd.f32 %v4121_v5, %v1352_v6  ;;  %v3681_v5 = vor.u32 %v4082_v57, %v3680_v38  ;;  %v3429_v6 = vor.u32 %v4014_v41, %v3426_v42  ;;  %v4039_v38 = vld [vmem:[#allocation7 + $0x1cc] sm:$0xf]  ;;  %v3553_v41 = vor.u32 %v4050_v22, %v3552_v21  ;;  %v4011_v21 = vld [vmem:[#allocation7 + $0xe4] sm:$0xf0] }
 0x22f   :  { %v3301_v42 = vor.u32 %v3982_v25, %v3298_v26  ;;  %v3656_v22 = vld [vmem:[#allocation7 + $0x2c8] sm:$0xf]  ;;  %v4007_v25 = vld [vmem:[#allocation7 + $0xcc] sm:$0xf] }
 0x230   :  { %vm1356_vm3 = vcmp.gt.f32.partialorder %v1353_v35, 0.0  ;;  %v1357_v31 = vmul.f32 0.2, %v1353_v35  ;;  %2383 = vmatpush.bf16.msrb.mxu3 %v3681_v5  ;;  %2396 = vmatpush.bf16.msra.mxu0 %v3429_v6  ;;  %v3557_v5 = vor.u32 %v4046_v27, %v3554_v28  ;;  %v3529_v6 = vor.u32 %v4043_v30, %v3528_v29  ;;  %v3402_v26 = vld [vmem:[#allocation7 + $0xe8] sm:$0xf0] }
 0x231   :  { %v4071_v27 = vld [vmem:[#allocation7 + $0x2cc] sm:$0xf]  ;;  %v3401_v29 = vor.u32 %v4011_v21, %v3400_v20  ;;  %v4104_v20 = vld [vmem:[#allocation7 + $0x3d4] sm:$0xf] }
 0x232   :  { %v1358_v36 = vsel %vm1356_vm3, %v1353_v35, %v1357_v31  ;;  %v3392_v35 = vld [vmem:[#allocation7 + $0xc0] sm:$0xf]  ;;  %v3658_v28 = vld [vmem:[#allocation7 + $0x2e8] sm:$0xf0]  ;;  %v3794_v21 = vld [vmem:[#allocation7 + $0x3f0] sm:$0xf0] }
 0x233   :  { %v1359_v40 = vpack.c.bf16 %v1358_v36, %v1358_v36  ;;  %v4010_v31 = vld [vmem:[#allocation7 + $0xdc] sm:$0xf0] }
 0x234   :  { %v3648_v36 = vld [vmem:[#allocation7 + $0x2c0] sm:$0xf]  ;;  %v3393_v50 = vor.u32 %v4010_v31, %v3392_v35  ;;  %2397 = vmatpush.bf16.msra.mxu0 %v3397_v52  ;;  %v3785_v35 = vor.u32 %v4107_v37, %v3784_v34  ;;  %v3533_v31 = vor.u32 %v4039_v38, %v3530_v39  ;;  %v3754_v52 = vld [vmem:[#allocation7 + $0x3a8] sm:$0xf0]  ;;  %v4003_v34 = vld [vmem:[#allocation7 + $0xa4] sm:$0xf0]  ;;  %v3661_v38 = vor.u32 %v4071_v27, %v3658_v28 }
 0x235   :  { %v1354_v46 = vpop.f32.mrf.mxu2  ;;  %1436 = vmatmul.bf16.vlgmr.msra.gmra.mxu3 %v1359_v40  ;;  %v3685_v40 = vor.u32 %v4078_v43, %v3682_v44  ;;  %v4103_v43 = vld [vmem:[#allocation7 + $0x3cc] sm:$0xf]  ;;  %v3624_v37 = vld [vmem:[#allocation7 + $0x288] sm:$0xf]  ;;  %v3504_v28 = vld [vmem:[#allocation7 + $0x190] sm:$0xf] }
 0x236   :  { %v4074_v46 = vld [vmem:[#allocation7 + $0x2dc] sm:$0xf0]  ;;  %2371 = vmatpush.bf16.msrb.mxu2 %v3393_v50  ;;  %v3786_v44 = vld [vmem:[#allocation7 + $0x3e8] sm:$0xf0]  ;;  %v4067_v39 = vld [vmem:[#allocation7 + $0x2a4] sm:$0xf0] }
 0x237   :  { %v3649_v51 = vor.u32 %v4074_v46, %v3648_v36  ;;  %2409 = vmatpush.bf16.msra.mxu1 %v3685_v40  ;;  %v3496_v36 = vld [vmem:[#allocation7 + $0x188] sm:$0xf]  ;;  %v3789_v47 = vor.u32 %v4103_v43, %v3786_v44  ;;  %v3498_v50 = vld [vmem:[#allocation7 + $0x1a8] sm:$0xf0] }
 0x238   :  { %2398 = vmatpush.bf16.msra.mxu0 %v3365_v2  ;;  %v4035_v40 = vld [vmem:[#allocation7 + $0x1a4] sm:$0xf0]  ;;  %v3501_v55 = vor.u32 %v4031_v49, %v3498_v50  ;;  %v3626_v43 = vld [vmem:[#allocation7 + $0x2a8] sm:$0xf0] }
 0x239   :  { %2384 = vmatpush.bf16.msrb.mxu3 %v3649_v51  ;;  %v3752_v46 = vld [vmem:[#allocation7 + $0x388] sm:$0xf]  ;;  %v4095_v51 = vld [vmem:[#allocation7 + $0x38c] sm:$0xf]  ;;  %v3497_v53 = vor.u32 %v4035_v40, %v3496_v36 }
 0x23a   :  { %2372 = vmatpush.bf16.msrb.mxu2 %v3361_v0  ;;  %v3753_v54 = vor.u32 %v4099_v48, %v3752_v46  ;;  %v3757_v60 = vor.u32 %v4095_v51, %v3754_v52  ;;  %v4087_v0 = vld [vmem:[#allocation7 + $0x34c] sm:$0xf]  ;;  %v3592_v36 = vld [vmem:[#allocation7 + $0x248] sm:$0xf] }
 0x23b   :  { %2410 = vmatpush.bf16.msra.mxu1 %v3653_v56  ;;  %v3464_v56 = vld [vmem:[#allocation7 + $0x148] sm:$0xf]  ;;  %v4055_v50 = vld [vmem:[#allocation7 + $0x24c] sm:$0xf] }
 0x23c   :  { %2399 = vmatpush.bf16.msra.mxu0 %v3333_v19  ;;  %v3465_v2 = vor.u32 %v4027_v58, %v3464_v56  ;;  %v3437_v19 = vor.u32 %v4015_v13, %v3434_v14  ;;  %v4059_v46 = vld [vmem:[#allocation7 + $0x264] sm:$0xf0]  ;;  %v3594_v51 = vld [vmem:[#allocation7 + $0x268] sm:$0xf0]  ;;  %v4044_v13 = vld [vmem:[#allocation7 + $0x1ec] sm:$0xf0] }
 0x23d   :  { %2385 = vmatpush.bf16.msrb.mxu3 %v3617_v1  ;;  %v3722_v1 = vld [vmem:[#allocation7 + $0x368] sm:$0xf0]  ;;  %v3593_v48 = vor.u32 %v4059_v46, %v3592_v36  ;;  %v3597_v52 = vor.u32 %v4055_v50, %v3594_v51  ;;  %v4051_v58 = vld [vmem:[#allocation7 + $0x224] sm:$0xf0]  ;;  %v3792_v14 = vld [vmem:[#allocation7 + $0x3d0] sm:$0xf] }
 0x23e   :  { %2373 = vmatpush.bf16.msrb.mxu2 %v3329_v15  ;;  %v3725_v11 = vor.u32 %v4087_v0, %v3722_v1  ;;  %v4079_v15 = vld [vmem:[#allocation7 + $0x30c] sm:$0xf]  ;;  %v4092_v36 = vld [vmem:[#allocation7 + $0x36c] sm:$0xf0]  ;;  %v3474_v46 = vld [vmem:[#allocation7 + $0x170] sm:$0xf0] }
 0x23f   :  { %2411 = vmatpush.bf16.msra.mxu1 %v3621_v9  ;;  %v4019_v9 = vld [vmem:[#allocation7 + $0x124] sm:$0xf0]  ;;  %v3562_v0 = vld [vmem:[#allocation7 + $0x228] sm:$0xf0]  ;;  %v3440_v50 = vld [vmem:[#allocation7 + $0x110] sm:$0xf] }
 0x240   :  { %2400 = vmatpush.bf16.msra.mxu0 %v3301_v42  ;;  %v4063_v42 = vld [vmem:[#allocation7 + $0x28c] sm:$0xf]  ;;  %v4020_v51 = vld [vmem:[#allocation7 + $0x12c] sm:$0xf0] }
 0x241   :  { %2386 = vmatpush.bf16.msrb.mxu3 %v3585_v18  ;;  %v3689_v18 = vor.u32 %v4083_v12, %v3688_v10  ;;  %v3536_v12 = vld [vmem:[#allocation7 + $0x1d0] sm:$0xf] }
 0x242   :  { %2374 = vmatpush.bf16.msrb.mxu2 %v3297_v33  ;;  %v3368_v33 = vld [vmem:[#allocation7 + $0x88] sm:$0xf] }
 0x243   :  { %2412 = vmatpush.bf16.msra.mxu1 %v3589_v24  ;;  %v4075_v24 = vld [vmem:[#allocation7 + $0x2e4] sm:$0xf0]  ;;  %v3369_v44 = vor.u32 %v4003_v34, %v3368_v33  ;;  %v3760_v33 = vld [vmem:[#allocation7 + $0x390] sm:$0xf] }
 0x244   :  { %v3657_v30 = vor.u32 %v4075_v24, %v3656_v22  ;;  %v4100_v34 = vld [vmem:[#allocation7 + $0x3ac] sm:$0xf0] }
 0x245   :  { %2387 = vmatpush.bf16.msrb.mxu3 %v3553_v41  ;;  %v3370_v41 = vld [vmem:[#allocation7 + $0xa8] sm:$0xf0] }
 0x246   :  { %2419 = vmatpush.bf16.msra.mxu2 %v3529_v6  ;;  %v3629_v6 = vor.u32 %v4063_v42, %v3626_v43  ;;  %v3762_v42 = vld [vmem:[#allocation7 + $0x3b0] sm:$0xf0] }
 0x247   :  { %2413 = vmatpush.bf16.msra.mxu1 %v3557_v5 }
 0x249   :  { %2432 = vmatpush.bf16.msra.mxu3 %v3785_v35  ;;  %v3336_v35 = vld [vmem:[#allocation7 + $0x48] sm:$0xf] }
 0x24a   :  { %2420 = vmatpush.bf16.msra.mxu2 %v3497_v53  ;;  %v3304_v53 = vld [vmem:[#allocation7 + $0x8] sm:$0xf] }
 0x24d   :  { %2433 = vmatpush.bf16.msra.mxu3 %v3753_v54  ;;  %v3987_v54 = vld [vmem:[#allocation7 + $0x24] sm:$0xf0] }
 0x24e   :  { %2421 = vmatpush.bf16.msra.mxu2 %v3465_v2  ;;  %v3305_v56 = vor.u32 %v3987_v54, %v3304_v53  ;;  %v1461_v2 = vld [vmem:[%s4565_s10] sm:$0x3]  ;;  %v3696_v54 = vld [vmem:[#allocation7 + $0x310] sm:$0xf] }
 0x251   :  { %2434 = vmatpush.bf16.msra.mxu3 %v3721_v3  ;;  %v1463_v3 = vperm.slane %v1461_v2, 0 }
 0x255   :  { %2435 = vmatpush.bf16.msra.mxu3 %v3689_v18 }
 0x259   :  { %2436 = vmatpush.bf16.msra.mxu3 %v3657_v30 }
 0x2b8   :  { %v1437_v17 = vpop.f32.mrf.mxu3 }
 0x2b9   :  { %v1438_v23 = vadd.f32 %v4122_v63, %v1437_v17  ;;  %v3466_v63 = vld [vmem:[#allocation7 + $0x168] sm:$0xf0]  ;;  %v3433_v17 = vor.u32 %v4019_v9, %v3432_v8 }
 0x2ba   :  { %v3469_v4 = vor.u32 %v4023_v62, %v3466_v63  ;;  %v4047_v63 = vld [vmem:[#allocation7 + $0x20c] sm:$0xf] }
 0x2bb   :  { %vm1441_vm4 = vcmp.gt.f32.partialorder %v1438_v23, 0.0  ;;  %v1442_v32 = vmul.f32 0.2, %v1438_v23  ;;  %2422 = vmatpush.bf16.msra.mxu2 %v3433_v17  ;;  %v3565_v1 = vor.u32 %v4047_v63, %v3562_v0  ;;  %v3408_v63 = vld [vmem:[#allocation7 + $0xd0] sm:$0xf] }
 0x2bc   :  { %v4012_v0 = vld [vmem:[#allocation7 + $0xec] sm:$0xf0] }
 0x2bd   :  { %v1443_v57 = vsel %vm1441_vm4, %v1438_v23, %v1442_v32  ;;  %v3693_v23 = vor.u32 %v4079_v15, %v3690_v16  ;;  %v3405_v32 = vor.u32 %v4007_v25, %v3402_v26  ;;  %v4108_v15 = vld [vmem:[#allocation7 + $0x3ec] sm:$0xf0]  ;;  %v4040_v16 = vld [vmem:[#allocation7 + $0x1d4] sm:$0xf]  ;;  %v3537_v26 = vor.u32 %v4044_v13, %v3536_v12 }
 0x2be   :  { %v1444_v45 = vpack.c.bf16 %v1443_v57, %v1443_v57  ;;  %v3999_v57 = vld [vmem:[#allocation7 + $0x8c] sm:$0xf]  ;;  %v3793_v27 = vor.u32 %v4108_v15, %v3792_v14  ;;  %v3409_v12 = vor.u32 %v4012_v0, %v3408_v63  ;;  %v3376_v14 = vld [vmem:[#allocation7 + $0x90] sm:$0xf] }
 0x2bf   :  { %2423 = vmatpush.bf16.msra.mxu2 %v3401_v29  ;;  %v3373_v5 = vor.u32 %v3999_v57, %v3370_v41  ;;  %v4036_v29 = vld [vmem:[#allocation7 + $0x1ac] sm:$0xf0]  ;;  %v3506_v57 = vld [vmem:[#allocation7 + $0x1b0] sm:$0xf0] }
 0x2c0   :  { %v1439_v7 = vpop.f32.mrf.mxu3  ;;  %1555 = vmatmul.bf16.vlgmr.msrb.gmra.mxu0 %v1444_v45  ;;  %1568 = vmatmul.bf16.vlgmr.msrb.gmra.mxu1 %v1444_v45  ;;  %v3625_v45 = vor.u32 %v4067_v39, %v3624_v37  ;;  %v4032_v37 = vld [vmem:[#allocation7 + $0x194] sm:$0xf]  ;;  %v3505_v43 = vor.u32 %v4036_v29, %v3504_v28  ;;  %v4004_v15 = vld [vmem:[#allocation7 + $0xac] sm:$0xf0] }
 0x2c1   :  { %2445 = vmatpush.bf16.msrb.mxu0 %v3533_v31  ;;  %2458 = vmatpush.bf16.msrb.mxu1 %v3789_v47  ;;  %v3995_v31 = vld [vmem:[#allocation7 + $0x64] sm:$0xf0]  ;;  %v3991_v7 = vld [vmem:[#allocation7 + $0x4c] sm:$0xf]  ;;  %v4096_v41 = vld [vmem:[#allocation7 + $0x394] sm:$0xf] }
 0x2c2   :  { %2437 = vmatpush.bf16.msra.mxu3 %v3625_v45  ;;  %v3337_v40 = vor.u32 %v3995_v31, %v3336_v35  ;;  %v3338_v47 = vld [vmem:[#allocation7 + $0x68] sm:$0xf0]  ;;  %v3472_v45 = vld [vmem:[#allocation7 + $0x150] sm:$0xf]  ;;  %v3765_v35 = vor.u32 %v4096_v41, %v3762_v42 }
 0x2c3   :  { %2424 = vmatpush.bf16.msra.mxu2 %v3369_v44  ;;  %v3341_v49 = vor.u32 %v3991_v7, %v3338_v47  ;;  %v3761_v44 = vor.u32 %v4100_v34, %v3760_v33  ;;  %v3728_v31 = vld [vmem:[#allocation7 + $0x350] sm:$0xf]  ;;  %v4088_v7 = vld [vmem:[#allocation7 + $0x354] sm:$0xf] }
 0x2c4   :  { %v3730_v47 = vld [vmem:[#allocation7 + $0x370] sm:$0xf0]  ;;  %v3344_v28 = vld [vmem:[#allocation7 + $0x50] sm:$0xf] }
 0x2c5   :  { %2446 = vmatpush.bf16.msrb.mxu0 %v3501_v55  ;;  %2459 = vmatpush.bf16.msrb.mxu1 %v3757_v60  ;;  %v3560_v55 = vld [vmem:[#allocation7 + $0x208] sm:$0xf]  ;;  %v3306_v60 = vld [vmem:[#allocation7 + $0x28] sm:$0xf0]  ;;  %v3733_v53 = vor.u32 %v4088_v7, %v3730_v47  ;;  %v3996_v29 = vld [vmem:[#allocation7 + $0x6c] sm:$0xf0] }
 0x2c6   :  { %2438 = vmatpush.bf16.msra.mxu3 %v3593_v48  ;;  %v3561_v61 = vor.u32 %v4051_v58, %v3560_v55  ;;  %v3309_v62 = vor.u32 %v3983_v59, %v3306_v60  ;;  %v4084_v55 = vld [vmem:[#allocation7 + $0x32c] sm:$0xf0]  ;;  %v3442_v58 = vld [vmem:[#allocation7 + $0x130] sm:$0xf0]  ;;  %v3345_v42 = vor.u32 %v3996_v29, %v3344_v28  ;;  %v3544_v7 = vld [vmem:[#allocation7 + $0x1d8] sm:$0xf] }
 0x2c7   :  { %2425 = vmatpush.bf16.msra.mxu2 %v3337_v40  ;;  %v4024_v40 = vld [vmem:[#allocation7 + $0x154] sm:$0xf]  ;;  %v3600_v33 = vld [vmem:[#allocation7 + $0x250] sm:$0xf]  ;;  %v4045_v47 = vld [vmem:[#allocation7 + $0x1f4] sm:$0xf0] }
 0x2c8   :  { %v4080_v59 = vld [vmem:[#allocation7 + $0x314] sm:$0xf]  ;;  %v4060_v34 = vld [vmem:[#allocation7 + $0x26c] sm:$0xf0] }
 0x2c9   :  { %2447 = vmatpush.bf16.msrb.mxu0 %v3469_v4  ;;  %2460 = vmatpush.bf16.msrb.mxu1 %v3725_v11  ;;  %v1464_v4 = vperm.slane %v1461_v2, 1  ;;  %v3698_v60 = vld [vmem:[#allocation7 + $0x330] sm:$0xf0]  ;;  %v3312_v41 = vld [vmem:[#allocation7 + $0x10] sm:$0xf] }
 0x2ca   :  { %2439 = vmatpush.bf16.msra.mxu3 %v3561_v61  ;;  %v3441_v61 = vor.u32 %v4020_v51, %v3440_v50  ;;  %v3701_v2 = vor.u32 %v4080_v59, %v3698_v60  ;;  %v4041_v50 = vld [vmem:[#allocation7 + $0x1dc] sm:$0xf]  ;;  %v3545_v59 = vor.u32 %v4045_v47, %v3544_v7  ;;  %v3384_v7 = vld [vmem:[#allocation7 + $0x98] sm:$0xf] }
 0x2cb   :  { %2426 = vmatpush.bf16.msra.mxu2 %v3305_v56  ;;  %v4016_v56 = vld [vmem:[#allocation7 + $0x114] sm:$0xf]  ;;  %v4005_v47 = vld [vmem:[#allocation7 + $0xb4] sm:$0xf0] }
 0x2cd   :  { %2448 = vmatpush.bf16.msrb.mxu0 %v3437_v19  ;;  %2461 = vmatpush.bf16.msrb.mxu1 %v3693_v23  ;;  %v3538_v19 = vld [vmem:[#allocation7 + $0x1f0] sm:$0xf0] }
 0x2ce   :  { %v3541_v30 = vor.u32 %v4040_v16, %v3538_v19  ;;  %v4068_v19 = vld [vmem:[#allocation7 + $0x2ac] sm:$0xf0] }
 0x2d1   :  { %2449 = vmatpush.bf16.msrb.mxu0 %v3405_v32  ;;  %2462 = vmatpush.bf16.msrb.mxu1 %v3661_v38  ;;  %v3797_v32 = vor.u32 %v4104_v20, %v3794_v21  ;;  %v4000_v20 = vld [vmem:[#allocation7 + $0x94] sm:$0xf] }
 0x2d2   :  { %v3378_v21 = vld [vmem:[#allocation7 + $0xb0] sm:$0xf0] }
 0x2d5   :  { %2450 = vmatpush.bf16.msrb.mxu0 %v3373_v5  ;;  %2463 = vmatpush.bf16.msrb.mxu1 %v3629_v6  ;;  %v4028_v5 = vld [vmem:[#allocation7 + $0x16c] sm:$0xf0]  ;;  %v3509_v6 = vor.u32 %v4032_v37, %v3506_v57  ;;  %v3992_v37 = vld [vmem:[#allocation7 + $0x54] sm:$0xf] }
 0x2d6   :  { %v3473_v48 = vor.u32 %v4028_v5, %v3472_v45  ;;  %v3602_v57 = vld [vmem:[#allocation7 + $0x270] sm:$0xf0]  ;;  %v3568_v45 = vld [vmem:[#allocation7 + $0x210] sm:$0xf] }
 0x2d7   :  { %v4052_v5 = vld [vmem:[#allocation7 + $0x22c] sm:$0xf0] }
 0x2d9   :  { %2451 = vmatpush.bf16.msrb.mxu0 %v3341_v49  ;;  %2464 = vmatpush.bf16.msrb.mxu1 %v3597_v52  ;;  %v3729_v49 = vor.u32 %v4092_v36, %v3728_v31  ;;  %v3477_v52 = vor.u32 %v4024_v40, %v3474_v46  ;;  %v3984_v31 = vld [vmem:[#allocation7 + $0x14] sm:$0xf] }
 0x2da   :  { %v3314_v36 = vld [vmem:[#allocation7 + $0x30] sm:$0xf0] }
 0x2db   :  { %v4048_v40 = vld [vmem:[#allocation7 + $0x214] sm:$0xf] }
 0x2dc   :  { %v3570_v46 = vld [vmem:[#allocation7 + $0x230] sm:$0xf0] }
 0x2dd   :  { %2452 = vmatpush.bf16.msrb.mxu0 %v3309_v62  ;;  %2465 = vmatpush.bf16.msrb.mxu1 %v3565_v1  ;;  %v3697_v62 = vor.u32 %v4084_v55, %v3696_v54  ;;  %v3445_v1 = vor.u32 %v4016_v56, %v3442_v58  ;;  %v4105_v54 = vld [vmem:[#allocation7 + $0x3dc] sm:$0xf]  ;;  %v3317_v56 = vor.u32 %v3984_v31, %v3314_v36 }
 0x2de   :  { %v3802_v55 = vld [vmem:[#allocation7 + $0x3f8] sm:$0xf0]  ;;  %v3573_v58 = vor.u32 %v4048_v40, %v3570_v46 }
 0x2df   :  { %v3805_v0 = vor.u32 %v4105_v54, %v3802_v55  ;;  %v4073_v31 = vld [vmem:[#allocation7 + $0x2dc] sm:$0xf] }
 0x2e0   :  { %v3674_v36 = vld [vmem:[#allocation7 + $0x2f8] sm:$0xf0] }
 0x2e1   :  { %v4065_v54 = vld [vmem:[#allocation7 + $0x29c] sm:$0xf] }
 0x2e2   :  { %v3642_v55 = vld [vmem:[#allocation7 + $0x2b8] sm:$0xf0] }
 0x33d   :  { %v1556_v8 = vpop.f32.mrf.mxu0  ;;  %v1569_v9 = vpop.f32.mrf.mxu1 }
 0x33e   :  { %v1557_v10 = vadd.f32 %v1556_v8, %v1463_v3  ;;  %v1570_v11 = vadd.f32 %v1569_v9, %v1464_v4  ;;  %v3664_v3 = vld [vmem:[#allocation7 + $0x2d0] sm:$0xf]  ;;  %v4008_v8 = vld [vmem:[#allocation7 + $0xd4] sm:$0xf] }
 0x33f   :  { %v4076_v4 = vld [vmem:[#allocation7 + $0x2ec] sm:$0xf0]  ;;  %v3410_v9 = vld [vmem:[#allocation7 + $0xf0] sm:$0xf0] }
 0x340   :  { %vm1573_vm5 = vcmp.gt.f32.partialorder %v1557_v10, 0.0  ;;  %v1575_v17 = vmul.f32 0.2, %v1557_v10  ;;  %vm1574_vm6 = vcmp.gt.f32.partialorder %v1570_v11, 0.0  ;;  %v1576_v18 = vmul.f32 0.2, %v1570_v11 }
 0x341   :  { %v3665_v13 = vor.u32 %v4076_v4, %v3664_v3  ;;  %v3413_v16 = vor.u32 %v4008_v8, %v3410_v9  ;;  %v4033_v3 = vld [vmem:[#allocation7 + $0x19c] sm:$0xf] }
 0x342   :  { %v1577_v22 = vsel %vm1573_vm5, %v1557_v10, %v1575_v17  ;;  %v1578_v23 = vsel %vm1574_vm6, %v1570_v11, %v1576_v18  ;;  %v4072_v10 = vld [vmem:[#allocation7 + $0x2d4] sm:$0xf]  ;;  %v3632_v18 = vld [vmem:[#allocation7 + $0x290] sm:$0xf]  ;;  %v3514_v4 = vld [vmem:[#allocation7 + $0x1b8] sm:$0xf0] }
 0x343   :  { %v4508_v24 = vpack.c.bf16 %v1577_v22, %v1577_v22  ;;  %v4510_v25 = vpack.c.bf16 %v1578_v23, %v1578_v23  ;;  %v3666_v11 = vld [vmem:[#allocation7 + $0x2f0] sm:$0xf0]  ;;  %v4097_v8 = vld [vmem:[#allocation7 + $0x39c] sm:$0xf] }
 0x344   :  { %v3669_v17 = vor.u32 %v4072_v10, %v3666_v11  ;;  %v4064_v22 = vld [vmem:[#allocation7 + $0x294] sm:$0xf]  ;;  %v3770_v9 = vld [vmem:[#allocation7 + $0x3b8] sm:$0xf0] }
 0x345   :  { %v1558_v38 = vpop.f32.mrf.mxu0  ;;  %v1571_v39 = vpop.f32.mrf.mxu1  ;;  %2375 = vmatmul.bf16.vlgmr.msrb.gmra.mxu2 %v4508_v24  ;;  %2388 = vmatmul.bf16.vlgmr.msrb.gmra.mxu3 %v4510_v25  ;;  %v3634_v23 = vld [vmem:[#allocation7 + $0x2b0] sm:$0xf0] }
 0x346   :  { %2401 = vmatmul.bf16.vlgmr.msra.gmra.mxu0 %v4508_v24  ;;  %2414 = vmatmul.bf16.vlgmr.msra.gmra.mxu1 %v4510_v25  ;;  %v3346_v38 = vld [vmem:[#allocation7 + $0x70] sm:$0xf0] }
 0x347   :  { %2471 = vmatpush.bf16.msrb.mxu2 %v3537_v26  ;;  %2484 = vmatpush.bf16.msrb.mxu3 %v3793_v27  ;;  %v3377_v26 = vor.u32 %v4004_v15, %v3376_v14  ;;  %v3633_v27 = vor.u32 %v4068_v19, %v3632_v18  ;;  %v4056_v39 = vld [vmem:[#allocation7 + $0x254] sm:$0xf]  ;;  %v3517_v14 = vor.u32 %v4033_v3, %v3514_v4  ;;  %v4025_v18 = vld [vmem:[#allocation7 + $0x15c] sm:$0xf] }
 0x348   :  { %2497 = vmatpush.bf16.msra.mxu0 %v3541_v30  ;;  %2510 = vmatpush.bf16.msra.mxu1 %v3797_v32  ;;  %v3381_v30 = vor.u32 %v4000_v20, %v3378_v21  ;;  %v3637_v32 = vor.u32 %v4064_v22, %v3634_v23  ;;  %v3773_v15 = vor.u32 %v4097_v8, %v3770_v9  ;;  %v3482_v19 = vld [vmem:[#allocation7 + $0x178] sm:$0xf0] }
 0x349   :  { %v4089_v20 = vld [vmem:[#allocation7 + $0x35c] sm:$0xf]  ;;  %v3485_v28 = vor.u32 %v4025_v18, %v3482_v19 }
 0x34a   :  { %v3738_v21 = vld [vmem:[#allocation7 + $0x378] sm:$0xf0] }
 0x34b   :  { %2472 = vmatpush.bf16.msrb.mxu2 %v3505_v43  ;;  %2485 = vmatpush.bf16.msrb.mxu3 %v3761_v44  ;;  %v3601_v43 = vor.u32 %v4060_v34, %v3600_v33  ;;  %v3988_v44 = vld [vmem:[#allocation7 + $0x2c] sm:$0xf0]  ;;  %v3741_v29 = vor.u32 %v4089_v20, %v3738_v21  ;;  %v4017_v33 = vld [vmem:[#allocation7 + $0x11c] sm:$0xf] }
 0x34c   :  { %2498 = vmatpush.bf16.msra.mxu0 %v3509_v6  ;;  %2511 = vmatpush.bf16.msra.mxu1 %v3765_v35  ;;  %v3349_v6 = vor.u32 %v3992_v37, %v3346_v38  ;;  %v3605_v35 = vor.u32 %v4056_v39, %v3602_v57  ;;  %v3313_v51 = vor.u32 %v3988_v44, %v3312_v41  ;;  %v3450_v34 = vld [vmem:[#allocation7 + $0x138] sm:$0xf0]  ;;  %v3416_v41 = vld [vmem:[#allocation7 + $0xd8] sm:$0xf] }
 0x34d   :  { %v4081_v37 = vld [vmem:[#allocation7 + $0x31c] sm:$0xf] }
 0x34e   :  { %v3706_v38 = vld [vmem:[#allocation7 + $0x338] sm:$0xf0] }
 0x34f   :  { %2473 = vmatpush.bf16.msrb.mxu2 %v3473_v48  ;;  %2486 = vmatpush.bf16.msrb.mxu3 %v3729_v49  ;;  %v3800_v48 = vld [vmem:[#allocation7 + $0x3d8] sm:$0xf]  ;;  %v3709_v44 = vor.u32 %v4081_v37, %v3706_v38  ;;  %v4057_v3 = vld [vmem:[#allocation7 + $0x25c] sm:$0xf] }
 0x350   :  { %2499 = vmatpush.bf16.msra.mxu0 %v3477_v52  ;;  %2512 = vmatpush.bf16.msra.mxu1 %v3733_v53  ;;  %v4109_v49 = vld [vmem:[#allocation7 + $0x3f4] sm:$0xf0]  ;;  %v3569_v52 = vor.u32 %v4052_v5, %v3568_v45  ;;  %v3546_v53 = vld [vmem:[#allocation7 + $0x1f8] sm:$0xf0] }
 0x351   :  { %v3801_v60 = vor.u32 %v4109_v49, %v3800_v48  ;;  %v3549_v63 = vor.u32 %v4041_v50, %v3546_v53  ;;  %v3672_v45 = vld [vmem:[#allocation7 + $0x2d8] sm:$0xf]  ;;  %v3677_v49 = vor.u32 %v4073_v31, %v3674_v36  ;;  %v3386_v53 = vld [vmem:[#allocation7 + $0xb8] sm:$0xf0] }
 0x352   :  { %v4077_v5 = vld [vmem:[#allocation7 + $0x2f4] sm:$0xf0]  ;;  %v3610_v4 = vld [vmem:[#allocation7 + $0x278] sm:$0xf0] }
 0x353   :  { %2474 = vmatpush.bf16.msrb.mxu2 %v3441_v61  ;;  %2487 = vmatpush.bf16.msrb.mxu3 %v3697_v62  ;;  %v3512_v61 = vld [vmem:[#allocation7 + $0x198] sm:$0xf]  ;;  %v3673_v46 = vor.u32 %v4077_v5, %v3672_v45  ;;  %v4049_v18 = vld [vmem:[#allocation7 + $0x21c] sm:$0xf] }
 0x354   :  { %2500 = vmatpush.bf16.msra.mxu0 %v3445_v1  ;;  %2513 = vmatpush.bf16.msra.mxu1 %v3701_v2  ;;  %v4037_v62 = vld [vmem:[#allocation7 + $0x1b4] sm:$0xf0]  ;;  %v3578_v19 = vld [vmem:[#allocation7 + $0x238] sm:$0xf0] }
 0x355   :  { %2427 = vmatmul.bf16.vlgmr.msra.gmra.mxu2 %v4508_v24  ;;  %2440 = vmatmul.bf16.vlgmr.msra.gmra.mxu3 %v4510_v25  ;;  %v3768_v1 = vld [vmem:[#allocation7 + $0x398] sm:$0xf]  ;;  %v3513_v10 = vor.u32 %v4037_v62, %v3512_v61  ;;  %v3645_v62 = vor.u32 %v4065_v54, %v3642_v55 }
 0x356   :  { %2453 = vmatmul.bf16.vlgmr.msrb.gmra.mxu0 %v4508_v24  ;;  %2466 = vmatmul.bf16.vlgmr.msrb.gmra.mxu1 %v4510_v25  ;;  %v4101_v2 = vld [vmem:[#allocation7 + $0x3b4] sm:$0xf0] }
 0x357   :  { %2475 = vmatpush.bf16.msrb.mxu2 %v3409_v12  ;;  %2488 = vmatpush.bf16.msrb.mxu3 %v3665_v13  ;;  %v3769_v11 = vor.u32 %v4101_v2, %v3768_v1  ;;  %v3480_v12 = vld [vmem:[#allocation7 + $0x158] sm:$0xf]  ;;  %v3993_v1 = vld [vmem:[#allocation7 + $0x5c] sm:$0xf] }
 0x358   :  { %2501 = vmatpush.bf16.msra.mxu0 %v3413_v16  ;;  %2514 = vmatpush.bf16.msra.mxu1 %v3669_v17  ;;  %v4029_v13 = vld [vmem:[#allocation7 + $0x174] sm:$0xf0]  ;;  %v3354_v2 = vld [vmem:[#allocation7 + $0x78] sm:$0xf0] }
 0x359   :  { %v3736_v16 = vld [vmem:[#allocation7 + $0x358] sm:$0xf]  ;;  %v3481_v22 = vor.u32 %v4029_v13, %v3480_v12  ;;  %v3357_v12 = vor.u32 %v3993_v1, %v3354_v2  ;;  %v3613_v13 = vor.u32 %v4057_v3, %v3610_v4 }
 0x35a   :  { %v4093_v17 = vld [vmem:[#allocation7 + $0x374] sm:$0xf0] }
 0x35b   :  { %2476 = vmatpush.bf16.msrb.mxu2 %v3377_v26  ;;  %2489 = vmatpush.bf16.msrb.mxu3 %v3633_v27  ;;  %v3737_v23 = vor.u32 %v4093_v17, %v3736_v16  ;;  %v3448_v26 = vld [vmem:[#allocation7 + $0x118] sm:$0xf]  ;;  %v3985_v16 = vld [vmem:[#allocation7 + $0x1c] sm:$0xf] }
 0x35c   :  { %2502 = vmatpush.bf16.msra.mxu0 %v3381_v30  ;;  %2515 = vmatpush.bf16.msra.mxu1 %v3637_v32  ;;  %v4021_v27 = vld [vmem:[#allocation7 + $0x134] sm:$0xf0]  ;;  %v3322_v17 = vld [vmem:[#allocation7 + $0x38] sm:$0xf0] }
 0x35d   :  { %v3704_v30 = vld [vmem:[#allocation7 + $0x318] sm:$0xf]  ;;  %v3449_v39 = vor.u32 %v4021_v27, %v3448_v26  ;;  %v1709_v26 = vld [vmem:[%s4567_s12] sm:$0xff] }
 0x35e   :  { %v4085_v32 = vld [vmem:[#allocation7 + $0x334] sm:$0xf0]  ;;  %v1712_v27 = vperm.slane %v1709_v26, 1  ;;  %v1713_v5 = vperm.slane %v1709_v26, 2  ;;  %v1717_v4 = vperm.slane %v1709_v26, 6 }
 0x35f   :  { %2477 = vmatpush.bf16.msrb.mxu2 %v3345_v42  ;;  %2490 = vmatpush.bf16.msrb.mxu3 %v3601_v43  ;;  %v3705_v57 = vor.u32 %v4085_v32, %v3704_v30  ;;  %v4013_v42 = vld [vmem:[#allocation7 + $0xf4] sm:$0xf0]  ;;  %v3453_v43 = vor.u32 %v4017_v33, %v3450_v34  ;;  %v1711_v32 = vperm.slane %v1709_v26, 0 }
 0x360   :  { %2503 = vmatpush.bf16.msra.mxu0 %v3349_v6  ;;  %2516 = vmatpush.bf16.msra.mxu1 %v3605_v35  ;;  %v4009_v6 = vld [vmem:[#allocation7 + $0xdc] sm:$0xf]  ;;  %v3417_v40 = vor.u32 %v4013_v42, %v3416_v41  ;;  %v3640_v50 = vld [vmem:[#allocation7 + $0x298] sm:$0xf]  ;;  %v1714_v42 = vperm.slane %v1709_v26, 3 }
 0x361   :  { %v3418_v35 = vld [vmem:[#allocation7 + $0xf8] sm:$0xf0] }
 0x362   :  { %v3421_v48 = vor.u32 %v4009_v6, %v3418_v35 }
 0x363   :  { %2478 = vmatpush.bf16.msrb.mxu2 %v3313_v51  ;;  %2491 = vmatpush.bf16.msrb.mxu3 %v3569_v52  ;;  %v4069_v51 = vld [vmem:[#allocation7 + $0x2b4] sm:$0xf0]  ;;  %v4001_v52 = vld [vmem:[#allocation7 + $0x9c] sm:$0xf] }
 0x364   :  { %2504 = vmatpush.bf16.msra.mxu0 %v3317_v56  ;;  %2517 = vmatpush.bf16.msra.mxu1 %v3573_v58  ;;  %v3385_v56 = vor.u32 %v4005_v47, %v3384_v7  ;;  %v3641_v58 = vor.u32 %v4069_v51, %v3640_v50  ;;  %v3389_v61 = vor.u32 %v4001_v52, %v3386_v53  ;;  %v1715_v53 = vperm.slane %v1709_v26, 4 }
 0x366   :  { %2479 = vmatmul.bf16.vlgmr.msrb.gmra.mxu2 %v4508_v24  ;;  %2492 = vmatmul.bf16.vlgmr.msrb.gmra.mxu3 %v4510_v25 }
 0x367   :  { %2523 = vmatpush.bf16.msra.mxu2 %v3545_v59  ;;  %2536 = vmatpush.bf16.msra.mxu3 %v3801_v60  ;;  %v3352_v59 = vld [vmem:[#allocation7 + $0x58] sm:$0xf] }
 0x368   :  { %2549 = vmatpush.bf16.msrb.mxu0 %v3549_v63  ;;  %2562 = vmatpush.bf16.msrb.mxu1 %v3805_v0  ;;  %v3997_v60 = vld [vmem:[#allocation7 + $0x74] sm:$0xf0] }
 0x369   :  { %2505 = vmatmul.bf16.vlgmr.msra.gmra.mxu0 %v4508_v24  ;;  %2518 = vmatmul.bf16.vlgmr.msra.gmra.mxu1 %v4510_v25  ;;  %v3608_v63 = vld [vmem:[#allocation7 + $0x258] sm:$0xf]  ;;  %v3353_v8 = vor.u32 %v3997_v60, %v3352_v59 }
 0x36a   :  { %v4061_v0 = vld [vmem:[#allocation7 + $0x274] sm:$0xf0] }
 0x36b   :  { %2524 = vmatpush.bf16.msra.mxu2 %v3513_v10  ;;  %2537 = vmatpush.bf16.msra.mxu3 %v3769_v11  ;;  %v3609_v9 = vor.u32 %v4061_v0, %v3608_v63  ;;  %v3320_v10 = vld [vmem:[#allocation7 + $0x18] sm:$0xf]  ;;  %v1718_v0 = vperm.slane %v1709_v26, 7 }
 0x36c   :  { %2550 = vmatpush.bf16.msrb.mxu0 %v3517_v14  ;;  %2563 = vmatpush.bf16.msrb.mxu1 %v3773_v15  ;;  %v3989_v11 = vld [vmem:[#allocation7 + $0x34] sm:$0xf0] }
 0x36d   :  { %v3576_v14 = vld [vmem:[#allocation7 + $0x218] sm:$0xf]  ;;  %v3321_v20 = vor.u32 %v3989_v11, %v3320_v10 }
 0x36e   :  { %v4053_v15 = vld [vmem:[#allocation7 + $0x234] sm:$0xf0] }
 0x36f   :  { %2525 = vmatpush.bf16.msra.mxu2 %v3481_v22  ;;  %2538 = vmatpush.bf16.msra.mxu3 %v3737_v23  ;;  %v3577_v21 = vor.u32 %v4053_v15, %v3576_v14  ;;  %v3325_v22 = vor.u32 %v3985_v16, %v3322_v17  ;;  %v3581_v23 = vor.u32 %v4049_v18, %v3578_v19 }
 0x370   :  { %2551 = vmatpush.bf16.msrb.mxu0 %v3485_v28  ;;  %2564 = vmatpush.bf16.msrb.mxu1 %v3741_v29 }
 0x373   :  { %2526 = vmatpush.bf16.msra.mxu2 %v3449_v39  ;;  %2539 = vmatpush.bf16.msra.mxu3 %v3705_v57 }
 0x374   :  { %2552 = vmatpush.bf16.msrb.mxu0 %v3453_v43  ;;  %2565 = vmatpush.bf16.msrb.mxu1 %v3709_v44 }
 0x377   :  { %2527 = vmatpush.bf16.msra.mxu2 %v3417_v40  ;;  %2540 = vmatpush.bf16.msra.mxu3 %v3673_v46 }
 0x378   :  { %2553 = vmatpush.bf16.msrb.mxu0 %v3421_v48  ;;  %2566 = vmatpush.bf16.msrb.mxu1 %v3677_v49  ;;  %v1716_v49 = vperm.slane %v1709_v26, 5 }
 0x37b   :  { %2528 = vmatpush.bf16.msra.mxu2 %v3385_v56  ;;  %2541 = vmatpush.bf16.msra.mxu3 %v3641_v58 }
 0x37c   :  { %2554 = vmatpush.bf16.msrb.mxu0 %v3389_v61  ;;  %2567 = vmatpush.bf16.msrb.mxu1 %v3645_v62 }
 0x37f   :  { %2529 = vmatpush.bf16.msra.mxu2 %v3353_v8  ;;  %2542 = vmatpush.bf16.msra.mxu3 %v3609_v9 }
 0x380   :  { %2555 = vmatpush.bf16.msrb.mxu0 %v3357_v12  ;;  %2568 = vmatpush.bf16.msrb.mxu1 %v3613_v13 }
 0x383   :  { %2530 = vmatpush.bf16.msra.mxu2 %v3321_v20  ;;  %2543 = vmatpush.bf16.msra.mxu3 %v3577_v21 }
 0x384   :  { %2556 = vmatpush.bf16.msrb.mxu0 %v3325_v22  ;;  %2569 = vmatpush.bf16.msrb.mxu1 %v3581_v23 }
 0x386   :  { %2531 = vmatmul.bf16.vlgmr.msra.gmra.mxu2 %v4508_v24  ;;  %2544 = vmatmul.bf16.vlgmr.msra.gmra.mxu3 %v4510_v25 }
 0x387   :  { %2557 = vmatmul.bf16.vlgmr.msrb.gmra.mxu0 %v4508_v24  ;;  %2570 = vmatmul.bf16.vlgmr.msrb.gmra.mxu1 %v4510_v25 }
 0x3c3   :  { %v2402_v28 = vpop.f32.mrf.mxu0  ;;  %v2415_v29 = vpop.f32.mrf.mxu1 }
 0x3c4   :  { %v2403_v30 = vadd.f32 %v2402_v28, %v1712_v27 }
 0x3c6   :  { %v2416_v33 = vadd.f32 %v2415_v29, %v2403_v30 }
 0x3c8   :  { %2576 = vst [vmem:[%s4568_s13 + $0x8] sm:$0xff] %v2416_v33  ;;  %v2376_v34 = vpop.f32.mrf.mxu2  ;;  %v2389_v37 = vpop.f32.mrf.mxu3 }
 0x3c9   :  { %v2377_v38 = vadd.f32 %v2376_v34, %v1711_v32 }
 0x3cb   :  { %v2390_v24 = vadd.f32 %v2389_v37, %v2377_v38  ;;  %v2404_v39 = vpop.f32.mrf.mxu0  ;;  %v2417_v25 = vpop.f32.mrf.mxu1 }
 0x3cd   :  { %2575 = vst [vmem:[%s4568_s13] sm:$0xff] %v2390_v24 }
 0x3d0   :  { %v2378_v57 = vpop.f32.mrf.mxu2  ;;  %v2391_v41 = vpop.f32.mrf.mxu3 }
 0x3d3   :  { %v2454_v43 = vpop.f32.mrf.mxu0  ;;  %v2467_v44 = vpop.f32.mrf.mxu1 }
 0x3d4   :  { %v2455_v45 = vadd.f32 %v2454_v43, %v1714_v42 }
 0x3d6   :  { %v2468_v6 = vadd.f32 %v2467_v44, %v2455_v45 }
 0x3d8   :  { %2578 = vst [vmem:[%s4568_s13 + $0x18] sm:$0xff] %v2468_v6  ;;  %v2428_v35 = vpop.f32.mrf.mxu2  ;;  %v2441_v31 = vpop.f32.mrf.mxu3 }
 0x3d9   :  { %v2429_v36 = vadd.f32 %v2428_v35, %v1713_v5 }
 0x3db   :  { %v2442_v40 = vadd.f32 %v2441_v31, %v2429_v36  ;;  %v2456_v46 = vpop.f32.mrf.mxu0  ;;  %v2469_v7 = vpop.f32.mrf.mxu1 }
 0x3dd   :  { %2577 = vst [vmem:[%s4568_s13 + $0x10] sm:$0xff] %v2442_v40 }
 0x3e0   :  { %v2430_v47 = vpop.f32.mrf.mxu2  ;;  %v2443_v48 = vpop.f32.mrf.mxu3 }
 0x3e6   :  { %v2506_v50 = vpop.f32.mrf.mxu0  ;;  %v2519_v51 = vpop.f32.mrf.mxu1 }
 0x3e7   :  { %v2507_v52 = vadd.f32 %v2506_v50, %v1716_v49 }
 0x3e9   :  { %v2520_v54 = vadd.f32 %v2519_v51, %v2507_v52  ;;  %v2480_v55 = vpop.f32.mrf.mxu2  ;;  %v2493_v56 = vpop.f32.mrf.mxu3 }
 0x3ea   :  { %v2481_v58 = vadd.f32 %v2480_v55, %v1715_v53 }
 0x3eb   :  { %2580 = vst [vmem:[%s4568_s13 + $0x28] sm:$0xff] %v2520_v54 }
 0x3ec   :  { %v2494_v59 = vadd.f32 %v2493_v56, %v2481_v58 }
 0x3ee   :  { %v2508_v60 = vpop.f32.mrf.mxu0  ;;  %v2521_v61 = vpop.f32.mrf.mxu1  ;;  %2579 = vst [vmem:[%s4568_s13 + $0x20] sm:$0xff] %v2494_v59 }
 0x3f1   :  { %v2482_v62 = vpop.f32.mrf.mxu2  ;;  %v2495_v63 = vpop.f32.mrf.mxu3 }
 0x404   :  { %v2558_v1 = vpop.f32.mrf.mxu0  ;;  %v2571_v2 = vpop.f32.mrf.mxu1 }
 0x405   :  { %v2559_v3 = vadd.f32 %v2558_v1, %v1718_v0 }
 0x407   :  { %v2572_v8 = vadd.f32 %v2571_v2, %v2559_v3 }
 0x409   :  { %2582 = vst [vmem:[%s4568_s13 + $0x38] sm:$0xff] %v2572_v8  ;;  %v2532_v9 = vpop.f32.mrf.mxu2  ;;  %v2545_v10 = vpop.f32.mrf.mxu3 }
 0x40a   :  { %v2533_v11 = vadd.f32 %v2532_v9, %v1717_v4 }
 0x40c   :  { %v2546_v12 = vadd.f32 %v2545_v10, %v2533_v11  ;;  %v2560_v13 = vpop.f32.mrf.mxu0  ;;  %v2573_v14 = vpop.f32.mrf.mxu1 }
 0x40e   :  { %2581 = vst [vmem:[%s4568_s13 + $0x30] sm:$0xff] %v2546_v12 }
 0x411   :  { %v2534_v15 = vpop.f32.mrf.mxu2  ;;  %v2547_v16 = vpop.f32.mrf.mxu3 }
 0x412   :  { %2587 = vsyncpa [#allocation3], 1 }
 0x413   :  { %2588 = vsyncpa [#allocation5], 1 }
 0x414   :  { %2589 = vsyncpa [#allocation8], 1 }

</bundles_post_ra>
